<compile_context>
chip_gen: v6e
topology: v6e:2x2x1
jax: 0.10.0
libtpu: 0.0.40
codegen_flags: <defaults>
</compile_context>

<pallas_src>
import jax
import jax.numpy as jnp
from jax.experimental import pallas as pl
from jax.experimental.pallas import tpu as pltpu


def stn3d_kernel(x_ref,
                 w1_ref, s1_ref, t1_ref,
                 w2_ref, s2_ref, t2_ref,
                 w3_ref, s3_ref, t3_ref,
                 w4_ref, s4_ref, t4_ref,
                 w5_ref, s5_ref, t5_ref,
                 w6_ref, b6_ref,
                 out_ref):
    tb, n, c = x_ref.shape
    x = x_ref[...].reshape(tb * n, c)                        # (TB*N, C) f32

    # --- conv1 + bn1 + relu : K=C is tiny -> VPU broadcast FMAs, not MXU.
    h = x[:, 0:1] * w1_ref[0:1, :]
    for ci in range(1, c):                                   # static unroll
        h = h + x[:, ci:ci + 1] * w1_ref[ci:ci + 1, :]
    h = jnp.maximum(h * s1_ref[...] + t1_ref[...], 0.0)      # (TB*N, 64)

    # --- conv2 + bn2 + relu (bf16 MXU, f32 accumulate)
    h = jnp.dot(h.astype(jnp.bfloat16), w2_ref[...],
                preferred_element_type=jnp.float32)
    h = jnp.maximum(h * s2_ref[...] + t2_ref[...], 0.0)      # (TB*N, 128)

    # --- conv3 + bn3 + relu
    h = jnp.dot(h.astype(jnp.bfloat16), w3_ref[...],
                preferred_element_type=jnp.float32)
    h = jnp.maximum(h * s3_ref[...] + t3_ref[...], 0.0)      # (TB*N, 1024)

    # --- global max pool over the N points of each batch element
    g = jnp.max(h.reshape(tb, n, 1024), axis=1)              # (TB, 1024)

    # --- fc1 + bn4 + relu
    f = jnp.dot(g.astype(jnp.bfloat16), w4_ref[...],
                preferred_element_type=jnp.float32)
    f = jnp.maximum(f * s4_ref[...] + t4_ref[...], 0.0)      # (TB, 512)

    # --- fc2 + bn5 + relu
    f = jnp.dot(f.astype(jnp.bfloat16), w5_ref[...],
                preferred_element_type=jnp.float32)
    f = jnp.maximum(f * s5_ref[...] + t5_ref[...], 0.0)      # (TB, 256)

    # --- fc3 (kept in f32) + flattened 3x3 identity
    f = jnp.dot(f, w6_ref[...], preferred_element_type=jnp.float32) + b6_ref[...]
    col = jax.lax.broadcasted_iota(jnp.int32, (tb, 9), 1)
    iden = jnp.where(col % 4 == 0, 1.0, 0.0).astype(jnp.float32)
    out_ref[...] = (f + iden).reshape(1, tb, 9)


def _pick_tb(batch, n_points, act_budget_bytes=12 * 1024 * 1024):
    """Largest divisor of batch (<=16) whose (TB*N,1024) f32 activation fits."""
    max_tb = max(1, act_budget_bytes // (n_points * 1024 * 4))
    tb = 1
    for d in range(1, min(batch, 16) + 1):
        if batch % d == 0 and d <= max_tb:
            tb = d
    return tb


def _fold_bn(bias, gamma, beta, mean, var, eps=1e-5):
    """Fold conv/linear bias + inference-mode BatchNorm into scale/shift."""
    scale = gamma / jnp.sqrt(var + eps)
    shift = beta - mean * scale
    return scale.reshape(1, -1), (bias * scale + shift).reshape(1, -1)


def stn3d_forward(x_bcn, params, tb=None):
    """x_bcn: (B, C, N) float32, as in the PyTorch module. Returns (B, 3, 3)."""
    # TODO(synk): fold this transpose into the kernel (channel-major layer 1)
    # to save one extra HBM pass over x.
    x = jnp.transpose(x_bcn, (0, 2, 1)).astype(jnp.float32)        # (B, N, C)
    B, N, C = x.shape
    if tb is None:
        tb = _pick_tb(B, N)
    assert B % tb == 0
    num_tiles = B // tb

    # bf16 operands for the MXU layers; layer 1 (VPU) and fc3 stay f32.
    w2 = params["w2"].astype(jnp.bfloat16)
    w3 = params["w3"].astype(jnp.bfloat16)
    w4 = params["w4"].astype(jnp.bfloat16)
    w5 = params["w5"].astype(jnp.bfloat16)

    flat = [x,
            params["w1"], params["s1"], params["t1"],
            w2, params["s2"], params["t2"],
            w3, params["s3"], params["t3"],
            w4, params["s4"], params["t4"],
            w5, params["s5"], params["t5"],
            params["w6"], params["b6"]]

    in_specs = [pl.BlockSpec((tb, N, C), lambda b: (b, 0, 0))]
    # Weights / scale-shift rows: constant index_map => DMA'd once, resident.
    for a in flat[1:]:
        in_specs.append(pl.BlockSpec(a.shape, lambda b: (0, 0)))

    flops = (2 * B * N * (C * 64 + 64 * 128 + 128 * 1024)
             + 2 * B * (1024 * 512 + 512 * 256 + 256 * 9))
    bytes_accessed = sum(int(a.size) * a.dtype.itemsize for a in flat) + B * 9 * 4

    out = pl.pallas_call(
        stn3d_kernel,
        out_shape=jax.ShapeDtypeStruct((num_tiles, tb, 9), jnp.float32),
        grid=(num_tiles,),
        in_specs=in_specs,
        out_specs=pl.BlockSpec((1, tb, 9), lambda b: (b, 0, 0)),
        compiler_params=pltpu.CompilerParams(
            dimension_semantics=("parallel",),        # shards batch over v7x's 2 TCs
            vmem_limit_bytes=64 * 1024 * 1024),
        cost_estimate=pl.CostEstimate(
            flops=flops, transcendentals=0, bytes_accessed=bytes_accessed),
    )(*flat)
    return out.reshape(B, 3, 3)


def init_params(channel, key):
    """Deterministic synthetic parameters matching STN3d's shapes."""
    dims = [(channel, 64), (64, 128), (128, 1024), (1024, 512), (512, 256), (256, 9)]
    keys = jax.random.split(key, 32)
    ki = iter(range(32))
    p = {}
    # Layers 1..5 carry a BatchNorm; layer 6 (fc3) has only a bias.
    for li, (cin, cout) in enumerate(dims, start=1):
        w = 0.1 * jax.random.normal(keys[next(ki)], (cin, cout), jnp.float32)
        b = 0.1 * jax.random.normal(keys[next(ki)], (cout,), jnp.float32)
        p[f"w{li}"] = w
        if li <= 5:
            gamma = 1.0 + 0.1 * jax.random.normal(keys[next(ki)], (cout,), jnp.float32)
            beta = 0.1 * jax.random.normal(keys[next(ki)], (cout,), jnp.float32)
            mean = 0.05 * jax.random.normal(keys[next(ki)], (cout,), jnp.float32)
            var = jnp.abs(1.0 + 0.1 * jax.random.normal(keys[next(ki)], (cout,), jnp.float32))
            s, t = _fold_bn(b, gamma, beta, mean, var)
            p[f"s{li}"], p[f"t{li}"] = s, t
        else:
            p["b6"] = b.reshape(1, -1)
    return p


def stn3d_reference(x_bcn, params):
    """Pure-JAX reference of the same folded, mixed-precision computation."""
    x = jnp.transpose(x_bcn, (0, 2, 1)).astype(jnp.float32)        # (B, N, C)
    B, N, C = x.shape
    bf = jnp.bfloat16
    h = x.reshape(B * N, C) @ params["w1"]
    h = jnp.maximum(h * params["s1"] + params["t1"], 0.0)
    h = jnp.dot(h.astype(bf), params["w2"].astype(bf),
                preferred_element_type=jnp.float32)
    h = jnp.maximum(h * params["s2"] + params["t2"], 0.0)
    h = jnp.dot(h.astype(bf), params["w3"].astype(bf),
                preferred_element_type=jnp.float32)
    h = jnp.maximum(h * params["s3"] + params["t3"], 0.0)
    g = jnp.max(h.reshape(B, N, 1024), axis=1)                     # (B, 1024)
    f = jnp.dot(g.astype(bf), params["w4"].astype(bf),
                preferred_element_type=jnp.float32)
    f = jnp.maximum(f * params["s4"] + params["t4"], 0.0)
    f = jnp.dot(f.astype(bf), params["w5"].astype(bf),
                preferred_element_type=jnp.float32)
    f = jnp.maximum(f * params["s5"] + params["t5"], 0.0)
    f = jnp.dot(f, params["w6"], preferred_element_type=jnp.float32) + params["b6"]
    iden = jnp.array([1, 0, 0, 0, 1, 0, 0, 0, 1], jnp.float32)
    return (f + iden).reshape(B, 3, 3)


if __name__ == "__main__":
    key = jax.random.PRNGKey(0)
    k_x, k_p = jax.random.split(key)

    B, C, N = 2, 4, 16                      # small shapes: batch=2, channel=4, 16 points
    x = jax.random.normal(k_x, (B, C, N), jnp.float32)
    params = init_params(C, k_p)

    out = jax.block_until_ready(stn3d_forward(x, params))
    ref = stn3d_reference(x, params)

    assert out.shape == (B, 3, 3)
    assert jnp.allclose(out, ref, atol=2e-3, rtol=2e-3), "mismatch vs reference"

    print("KERNEL_OK")
</pallas_src>

<mosaic_0001>
module attributes {stable_mosaic.version = 11 : i64} {
  func.func @stn3d_kernel(%arg0: i32, %arg1: memref<2x16x4xf32, #tpu.memory_space<vmem>>, %arg2: memref<4x64xf32, #tpu.memory_space<vmem>>, %arg3: memref<1x64xf32, #tpu.memory_space<vmem>>, %arg4: memref<1x64xf32, #tpu.memory_space<vmem>>, %arg5: memref<64x128xbf16, #tpu.memory_space<vmem>>, %arg6: memref<1x128xf32, #tpu.memory_space<vmem>>, %arg7: memref<1x128xf32, #tpu.memory_space<vmem>>, %arg8: memref<128x1024xbf16, #tpu.memory_space<vmem>>, %arg9: memref<1x1024xf32, #tpu.memory_space<vmem>>, %arg10: memref<1x1024xf32, #tpu.memory_space<vmem>>, %arg11: memref<1024x512xbf16, #tpu.memory_space<vmem>>, %arg12: memref<1x512xf32, #tpu.memory_space<vmem>>, %arg13: memref<1x512xf32, #tpu.memory_space<vmem>>, %arg14: memref<512x256xbf16, #tpu.memory_space<vmem>>, %arg15: memref<1x256xf32, #tpu.memory_space<vmem>>, %arg16: memref<1x256xf32, #tpu.memory_space<vmem>>, %arg17: memref<256x9xf32, #tpu.memory_space<vmem>>, %arg18: memref<1x9xf32, #tpu.memory_space<vmem>>, %arg19: memref<1x2x9xf32, #tpu.memory_space<vmem>>) attributes {dimension_semantics = [#tpu.dimension_semantics<parallel>], iteration_bounds = array<i64: 1>, scalar_prefetch = 0 : i64, scratch_operands = 0 : i64, tpu.core_type = #tpu.core_type<tc>, window_params = [{transform_indices = @transform_0, window_bounds = array<i64: 2, 16, 4>}, {pipeline_mode = #tpu.pipeline_mode<synchronous>, transform_indices = @transform_1, window_bounds = array<i64: 4, 64>}, {pipeline_mode = #tpu.pipeline_mode<synchronous>, transform_indices = @transform_2, window_bounds = array<i64: 1, 64>}, {pipeline_mode = #tpu.pipeline_mode<synchronous>, transform_indices = @transform_3, window_bounds = array<i64: 1, 64>}, {pipeline_mode = #tpu.pipeline_mode<synchronous>, transform_indices = @transform_4, window_bounds = array<i64: 64, 128>}, {pipeline_mode = #tpu.pipeline_mode<synchronous>, transform_indices = @transform_5, window_bounds = array<i64: 1, 128>}, {pipeline_mode = #tpu.pipeline_mode<synchronous>, transform_indices = @transform_6, window_bounds = array<i64: 1, 128>}, {pipeline_mode = #tpu.pipeline_mode<synchronous>, transform_indices = @transform_7, window_bounds = array<i64: 128, 1024>}, {pipeline_mode = #tpu.pipeline_mode<synchronous>, transform_indices = @transform_8, window_bounds = array<i64: 1, 1024>}, {pipeline_mode = #tpu.pipeline_mode<synchronous>, transform_indices = @transform_9, window_bounds = array<i64: 1, 1024>}, {pipeline_mode = #tpu.pipeline_mode<synchronous>, transform_indices = @transform_10, window_bounds = array<i64: 1024, 512>}, {pipeline_mode = #tpu.pipeline_mode<synchronous>, transform_indices = @transform_11, window_bounds = array<i64: 1, 512>}, {pipeline_mode = #tpu.pipeline_mode<synchronous>, transform_indices = @transform_12, window_bounds = array<i64: 1, 512>}, {pipeline_mode = #tpu.pipeline_mode<synchronous>, transform_indices = @transform_13, window_bounds = array<i64: 512, 256>}, {pipeline_mode = #tpu.pipeline_mode<synchronous>, transform_indices = @transform_14, window_bounds = array<i64: 1, 256>}, {pipeline_mode = #tpu.pipeline_mode<synchronous>, transform_indices = @transform_15, window_bounds = array<i64: 1, 256>}, {pipeline_mode = #tpu.pipeline_mode<synchronous>, transform_indices = @transform_16, window_bounds = array<i64: 256, 9>}, {pipeline_mode = #tpu.pipeline_mode<synchronous>, transform_indices = @transform_17, window_bounds = array<i64: 1, 9>}, {transform_indices = @transform_18, window_bounds = array<i64: 1, 2, 9>}]} {
    %c0 = arith.constant 0 : index
    %c0_0 = arith.constant 0 : index
    %c0_1 = arith.constant 0 : index
    %0 = vector.load %arg1[%c0, %c0_0, %c0_1] : memref<2x16x4xf32, #tpu.memory_space<vmem>>, vector<2x16x4xf32>
    %1 = vector.shape_cast %0 : vector<2x16x4xf32> to vector<32x4xf32>
    %2 = vector.extract_strided_slice %1 {offsets = [0, 0], sizes = [32, 1], strides = [1, 1]} : vector<32x4xf32> to vector<32x1xf32>
    %c0_2 = arith.constant 0 : index
    %c0_3 = arith.constant 0 : index
    %3 = vector.load %arg2[%c0_2, %c0_3] : memref<4x64xf32, #tpu.memory_space<vmem>>, vector<1x64xf32>
    %4 = vector.broadcast %2 : vector<32x1xf32> to vector<32x64xf32>
    %5 = vector.broadcast %3 : vector<1x64xf32> to vector<32x64xf32>
    %6 = arith.mulf %4, %5 : vector<32x64xf32>
    %7 = vector.extract_strided_slice %1 {offsets = [0, 1], sizes = [32, 1], strides = [1, 1]} : vector<32x4xf32> to vector<32x1xf32>
    %c1 = arith.constant 1 : index
    %c0_4 = arith.constant 0 : index
    %8 = vector.load %arg2[%c1, %c0_4] : memref<4x64xf32, #tpu.memory_space<vmem>>, vector<1x64xf32>
    %9 = vector.broadcast %7 : vector<32x1xf32> to vector<32x64xf32>
    %10 = vector.broadcast %8 : vector<1x64xf32> to vector<32x64xf32>
    %11 = arith.mulf %9, %10 : vector<32x64xf32>
    %12 = arith.addf %6, %11 : vector<32x64xf32>
    %13 = vector.extract_strided_slice %1 {offsets = [0, 2], sizes = [32, 1], strides = [1, 1]} : vector<32x4xf32> to vector<32x1xf32>
    %c2 = arith.constant 2 : index
    %c0_5 = arith.constant 0 : index
    %14 = vector.load %arg2[%c2, %c0_5] : memref<4x64xf32, #tpu.memory_space<vmem>>, vector<1x64xf32>
    %15 = vector.broadcast %13 : vector<32x1xf32> to vector<32x64xf32>
    %16 = vector.broadcast %14 : vector<1x64xf32> to vector<32x64xf32>
    %17 = arith.mulf %15, %16 : vector<32x64xf32>
    %18 = arith.addf %12, %17 : vector<32x64xf32>
    %19 = vector.extract_strided_slice %1 {offsets = [0, 3], sizes = [32, 1], strides = [1, 1]} : vector<32x4xf32> to vector<32x1xf32>
    %c3 = arith.constant 3 : index
    %c0_6 = arith.constant 0 : index
    %20 = vector.load %arg2[%c3, %c0_6] : memref<4x64xf32, #tpu.memory_space<vmem>>, vector<1x64xf32>
    %21 = vector.broadcast %19 : vector<32x1xf32> to vector<32x64xf32>
    %22 = vector.broadcast %20 : vector<1x64xf32> to vector<32x64xf32>
    %23 = arith.mulf %21, %22 : vector<32x64xf32>
    %24 = arith.addf %18, %23 : vector<32x64xf32>
    %c0_7 = arith.constant 0 : index
    %c0_8 = arith.constant 0 : index
    %25 = vector.load %arg3[%c0_7, %c0_8] : memref<1x64xf32, #tpu.memory_space<vmem>>, vector<1x64xf32>
    %26 = vector.broadcast %25 : vector<1x64xf32> to vector<32x64xf32>
    %27 = arith.mulf %24, %26 : vector<32x64xf32>
    %c0_9 = arith.constant 0 : index
    %c0_10 = arith.constant 0 : index
    %28 = vector.load %arg4[%c0_9, %c0_10] : memref<1x64xf32, #tpu.memory_space<vmem>>, vector<1x64xf32>
    %29 = vector.broadcast %28 : vector<1x64xf32> to vector<32x64xf32>
    %30 = arith.addf %27, %29 : vector<32x64xf32>
    %cst = arith.constant 0.000000e+00 : f32
    %31 = vector.broadcast %cst : f32 to vector<32x64xf32>
    %32 = arith.maximumf %30, %31 : vector<32x64xf32>
    %33 = arith.truncf %32 : vector<32x64xf32> to vector<32x64xbf16>
    %c0_11 = arith.constant 0 : index
    %c0_12 = arith.constant 0 : index
    %34 = vector.load %arg5[%c0_11, %c0_12] : memref<64x128xbf16, #tpu.memory_space<vmem>>, vector<64x128xbf16>
    %cst_13 = arith.constant dense<0.000000e+00> : vector<32x128xf32>
    %35 = tpu.matmul %33, %34, %cst_13 {dimension_numbers = #tpu.dot_dimension_numbers<[1], [0], [0], [1], [0, 0, 1, 1], [], []>} : vector<32x64xbf16>, vector<64x128xbf16>, vector<32x128xf32> -> vector<32x128xf32>
    %c0_14 = arith.constant 0 : index
    %c0_15 = arith.constant 0 : index
    %36 = vector.load %arg6[%c0_14, %c0_15] : memref<1x128xf32, #tpu.memory_space<vmem>>, vector<1x128xf32>
    %37 = vector.broadcast %36 : vector<1x128xf32> to vector<32x128xf32>
    %38 = arith.mulf %35, %37 : vector<32x128xf32>
    %c0_16 = arith.constant 0 : index
    %c0_17 = arith.constant 0 : index
    %39 = vector.load %arg7[%c0_16, %c0_17] : memref<1x128xf32, #tpu.memory_space<vmem>>, vector<1x128xf32>
    %40 = vector.broadcast %39 : vector<1x128xf32> to vector<32x128xf32>
    %41 = arith.addf %38, %40 : vector<32x128xf32>
    %cst_18 = arith.constant 0.000000e+00 : f32
    %42 = vector.broadcast %cst_18 : f32 to vector<32x128xf32>
    %43 = arith.maximumf %41, %42 : vector<32x128xf32>
    %44 = arith.truncf %43 : vector<32x128xf32> to vector<32x128xbf16>
    %c0_19 = arith.constant 0 : index
    %c0_20 = arith.constant 0 : index
    %45 = vector.load %arg8[%c0_19, %c0_20] : memref<128x1024xbf16, #tpu.memory_space<vmem>>, vector<128x1024xbf16>
    %cst_21 = arith.constant dense<0.000000e+00> : vector<32x1024xf32>
    %46 = tpu.matmul %44, %45, %cst_21 {dimension_numbers = #tpu.dot_dimension_numbers<[1], [0], [0], [1], [0, 0, 1, 1], [], []>} : vector<32x128xbf16>, vector<128x1024xbf16>, vector<32x1024xf32> -> vector<32x1024xf32>
    %c0_22 = arith.constant 0 : index
    %c0_23 = arith.constant 0 : index
    %47 = vector.load %arg9[%c0_22, %c0_23] : memref<1x1024xf32, #tpu.memory_space<vmem>>, vector<1x1024xf32>
    %48 = vector.broadcast %47 : vector<1x1024xf32> to vector<32x1024xf32>
    %49 = arith.mulf %46, %48 : vector<32x1024xf32>
    %c0_24 = arith.constant 0 : index
    %c0_25 = arith.constant 0 : index
    %50 = vector.load %arg10[%c0_24, %c0_25] : memref<1x1024xf32, #tpu.memory_space<vmem>>, vector<1x1024xf32>
    %51 = vector.broadcast %50 : vector<1x1024xf32> to vector<32x1024xf32>
    %52 = arith.addf %49, %51 : vector<32x1024xf32>
    %cst_26 = arith.constant 0.000000e+00 : f32
    %53 = vector.broadcast %cst_26 : f32 to vector<32x1024xf32>
    %54 = arith.maximumf %52, %53 : vector<32x1024xf32>
    %55 = vector.shape_cast %54 : vector<32x1024xf32> to vector<2x16x1024xf32>
    %cst_27 = arith.constant dense<0xFF800000> : vector<2x1024xf32>
    %56 = vector.multi_reduction <maximumf>, %55, %cst_27 [1] : vector<2x16x1024xf32> to vector<2x1024xf32>
    %57 = arith.truncf %56 : vector<2x1024xf32> to vector<2x1024xbf16>
    %c0_28 = arith.constant 0 : index
    %c0_29 = arith.constant 0 : index
    %58 = vector.load %arg11[%c0_28, %c0_29] : memref<1024x512xbf16, #tpu.memory_space<vmem>>, vector<1024x512xbf16>
    %cst_30 = arith.constant dense<0.000000e+00> : vector<2x512xf32>
    %59 = tpu.matmul %57, %58, %cst_30 {dimension_numbers = #tpu.dot_dimension_numbers<[1], [0], [0], [1], [0, 0, 1, 1], [], []>} : vector<2x1024xbf16>, vector<1024x512xbf16>, vector<2x512xf32> -> vector<2x512xf32>
    %c0_31 = arith.constant 0 : index
    %c0_32 = arith.constant 0 : index
    %60 = vector.load %arg12[%c0_31, %c0_32] : memref<1x512xf32, #tpu.memory_space<vmem>>, vector<1x512xf32>
    %61 = vector.broadcast %60 : vector<1x512xf32> to vector<2x512xf32>
    %62 = arith.mulf %59, %61 : vector<2x512xf32>
    %c0_33 = arith.constant 0 : index
    %c0_34 = arith.constant 0 : index
    %63 = vector.load %arg13[%c0_33, %c0_34] : memref<1x512xf32, #tpu.memory_space<vmem>>, vector<1x512xf32>
    %64 = vector.broadcast %63 : vector<1x512xf32> to vector<2x512xf32>
    %65 = arith.addf %62, %64 : vector<2x512xf32>
    %cst_35 = arith.constant 0.000000e+00 : f32
    %66 = vector.broadcast %cst_35 : f32 to vector<2x512xf32>
    %67 = arith.maximumf %65, %66 : vector<2x512xf32>
    %68 = arith.truncf %67 : vector<2x512xf32> to vector<2x512xbf16>
    %c0_36 = arith.constant 0 : index
    %c0_37 = arith.constant 0 : index
    %69 = vector.load %arg14[%c0_36, %c0_37] : memref<512x256xbf16, #tpu.memory_space<vmem>>, vector<512x256xbf16>
    %cst_38 = arith.constant dense<0.000000e+00> : vector<2x256xf32>
    %70 = tpu.matmul %68, %69, %cst_38 {dimension_numbers = #tpu.dot_dimension_numbers<[1], [0], [0], [1], [0, 0, 1, 1], [], []>} : vector<2x512xbf16>, vector<512x256xbf16>, vector<2x256xf32> -> vector<2x256xf32>
    %c0_39 = arith.constant 0 : index
    %c0_40 = arith.constant 0 : index
    %71 = vector.load %arg15[%c0_39, %c0_40] : memref<1x256xf32, #tpu.memory_space<vmem>>, vector<1x256xf32>
    %72 = vector.broadcast %71 : vector<1x256xf32> to vector<2x256xf32>
    %73 = arith.mulf %70, %72 : vector<2x256xf32>
    %c0_41 = arith.constant 0 : index
    %c0_42 = arith.constant 0 : index
    %74 = vector.load %arg16[%c0_41, %c0_42] : memref<1x256xf32, #tpu.memory_space<vmem>>, vector<1x256xf32>
    %75 = vector.broadcast %74 : vector<1x256xf32> to vector<2x256xf32>
    %76 = arith.addf %73, %75 : vector<2x256xf32>
    %cst_43 = arith.constant 0.000000e+00 : f32
    %77 = vector.broadcast %cst_43 : f32 to vector<2x256xf32>
    %78 = arith.maximumf %76, %77 : vector<2x256xf32>
    %c0_44 = arith.constant 0 : index
    %c0_45 = arith.constant 0 : index
    %79 = vector.load %arg17[%c0_44, %c0_45] : memref<256x9xf32, #tpu.memory_space<vmem>>, vector<256x9xf32>
    %cst_46 = arith.constant dense<0.000000e+00> : vector<2x9xf32>
    %80 = tpu.matmul %78, %79, %cst_46 {dimension_numbers = #tpu.dot_dimension_numbers<[1], [0], [0], [1], [0, 0, 1, 1], [], []>} : vector<2x256xf32>, vector<256x9xf32>, vector<2x9xf32> -> vector<2x9xf32>
    %c0_47 = arith.constant 0 : index
    %c0_48 = arith.constant 0 : index
    %81 = vector.load %arg18[%c0_47, %c0_48] : memref<1x9xf32, #tpu.memory_space<vmem>>, vector<1x9xf32>
    %82 = vector.broadcast %81 : vector<1x9xf32> to vector<2x9xf32>
    %83 = arith.addf %80, %82 : vector<2x9xf32>
    %84 = tpu.iota {dimensions = array<i32: 1>} : vector<2x9xi32>
    %c4_i32 = arith.constant 4 : i32
    %c0_i32 = arith.constant 0 : i32
    %85 = arith.cmpi eq, %c4_i32, %c0_i32 : i32
    %c1_i32 = arith.constant 1 : i32
    %86 = arith.select %85, %c1_i32, %c4_i32 : i32
    %87 = vector.broadcast %86 : i32 to vector<2x9xi32>
    %88 = arith.remsi %84, %87 : vector<2x9xi32>
    %c0_i32_49 = arith.constant 0 : i32
    %89 = vector.broadcast %c0_i32_49 : i32 to vector<2x9xi32>
    %90 = arith.cmpi ne, %88, %89 : vector<2x9xi32>
    %c0_i32_50 = arith.constant 0 : i32
    %91 = vector.broadcast %c0_i32_50 : i32 to vector<2x9xi32>
    %92 = arith.cmpi slt, %88, %91 : vector<2x9xi32>
    %c0_i32_51 = arith.constant 0 : i32
    %93 = arith.cmpi slt, %86, %c0_i32_51 : i32
    %94 = vector.broadcast %93 : i1 to vector<2x9xi1>
    %95 = vector.broadcast %94 : vector<2x9xi1> to vector<2x9xi1>
    %96 = arith.xori %92, %95 : vector<2x9xi1>
    %97 = arith.andi %96, %90 : vector<2x9xi1>
    %98 = vector.broadcast %86 : i32 to vector<2x9xi32>
    %99 = arith.addi %88, %98 : vector<2x9xi32>
    %100 = arith.select %97, %99, %88 : vector<2x9xi1>, vector<2x9xi32>
    %c0_i32_52 = arith.constant 0 : i32
    %101 = vector.broadcast %c0_i32_52 : i32 to vector<2x9xi32>
    %102 = arith.cmpi eq, %100, %101 : vector<2x9xi32>
    %cst_53 = arith.constant 1.000000e+00 : f32
    %cst_54 = arith.constant 0.000000e+00 : f32
    %103 = vector.broadcast %cst_53 : f32 to vector<2x9xf32>
    %104 = vector.broadcast %cst_54 : f32 to vector<2x9xf32>
    %105 = arith.select %102, %103, %104 : vector<2x9xi1>, vector<2x9xf32>
    %106 = arith.addf %83, %105 : vector<2x9xf32>
    %107 = vector.shape_cast %106 : vector<2x9xf32> to vector<1x2x9xf32>
    %c0_55 = arith.constant 0 : index
    %c0_56 = arith.constant 0 : index
    %c0_57 = arith.constant 0 : index
    %108 = vector.load %arg19[%c0_55, %c0_56, %c0_57] : memref<1x2x9xf32, #tpu.memory_space<vmem>>, vector<1x2x9xf32>
    tpu.vector_store %arg19[%c0_55, %c0_56, %c0_57], %107 {strides = array<i32>} : memref<1x2x9xf32, #tpu.memory_space<vmem>>, vector<1x2x9xf32>,
    return
  }
  func.func @transform_0(%arg0: i32) -> (i32, i32, i32) {
    %c0_i32 = arith.constant 0 : i32
    %c0_i32_0 = arith.constant 0 : i32
    %c0_i32_1 = arith.constant 0 : i32
    return %arg0, %c0_i32, %c0_i32_0 : i32, i32, i32
  }
  func.func @transform_1(%arg0: i32) -> (i32, i32) {
    %c0_i32 = arith.constant 0 : i32
    %c0_i32_0 = arith.constant 0 : i32
    %c0_i32_1 = arith.constant 0 : i32
    return %c0_i32, %c0_i32_0 : i32, i32
  }
  func.func @transform_2(%arg0: i32) -> (i32, i32) {
    %c0_i32 = arith.constant 0 : i32
    %c0_i32_0 = arith.constant 0 : i32
    %c0_i32_1 = arith.constant 0 : i32
    return %c0_i32, %c0_i32_0 : i32, i32
  }
  func.func @transform_3(%arg0: i32) -> (i32, i32) {
    %c0_i32 = arith.constant 0 : i32
    %c0_i32_0 = arith.constant 0 : i32
    %c0_i32_1 = arith.constant 0 : i32
    return %c0_i32, %c0_i32_0 : i32, i32
  }
  func.func @transform_4(%arg0: i32) -> (i32, i32) {
    %c0_i32 = arith.constant 0 : i32
    %c0_i32_0 = arith.constant 0 : i32
    %c0_i32_1 = arith.constant 0 : i32
    return %c0_i32, %c0_i32_0 : i32, i32
  }
  func.func @transform_5(%arg0: i32) -> (i32, i32) {
    %c0_i32 = arith.constant 0 : i32
    %c0_i32_0 = arith.constant 0 : i32
    %c0_i32_1 = arith.constant 0 : i32
    return %c0_i32, %c0_i32_0 : i32, i32
  }
  func.func @transform_6(%arg0: i32) -> (i32, i32) {
    %c0_i32 = arith.constant 0 : i32
    %c0_i32_0 = arith.constant 0 : i32
    %c0_i32_1 = arith.constant 0 : i32
    return %c0_i32, %c0_i32_0 : i32, i32
  }
  func.func @transform_7(%arg0: i32) -> (i32, i32) {
    %c0_i32 = arith.constant 0 : i32
    %c0_i32_0 = arith.constant 0 : i32
    %c0_i32_1 = arith.constant 0 : i32
    return %c0_i32, %c0_i32_0 : i32, i32
  }
  func.func @transform_8(%arg0: i32) -> (i32, i32) {
    %c0_i32 = arith.constant 0 : i32
    %c0_i32_0 = arith.constant 0 : i32
    %c0_i32_1 = arith.constant 0 : i32
    return %c0_i32, %c0_i32_0 : i32, i32
  }
  func.func @transform_9(%arg0: i32) -> (i32, i32) {
    %c0_i32 = arith.constant 0 : i32
    %c0_i32_0 = arith.constant 0 : i32
    %c0_i32_1 = arith.constant 0 : i32
    return %c0_i32, %c0_i32_0 : i32, i32
  }
  func.func @transform_10(%arg0: i32) -> (i32, i32) {
    %c0_i32 = arith.constant 0 : i32
    %c0_i32_0 = arith.constant 0 : i32
    %c0_i32_1 = arith.constant 0 : i32
    return %c0_i32, %c0_i32_0 : i32, i32
  }
  func.func @transform_11(%arg0: i32) -> (i32, i32) {
    %c0_i32 = arith.constant 0 : i32
    %c0_i32_0 = arith.constant 0 : i32
    %c0_i32_1 = arith.constant 0 : i32
    return %c0_i32, %c0_i32_0 : i32, i32
  }
  func.func @transform_12(%arg0: i32) -> (i32, i32) {
    %c0_i32 = arith.constant 0 : i32
    %c0_i32_0 = arith.constant 0 : i32
    %c0_i32_1 = arith.constant 0 : i32
    return %c0_i32, %c0_i32_0 : i32, i32
  }
  func.func @transform_13(%arg0: i32) -> (i32, i32) {
    %c0_i32 = arith.constant 0 : i32
    %c0_i32_0 = arith.constant 0 : i32
    %c0_i32_1 = arith.constant 0 : i32
    return %c0_i32, %c0_i32_0 : i32, i32
  }
  func.func @transform_14(%arg0: i32) -> (i32, i32) {
    %c0_i32 = arith.constant 0 : i32
    %c0_i32_0 = arith.constant 0 : i32
    %c0_i32_1 = arith.constant 0 : i32
    return %c0_i32, %c0_i32_0 : i32, i32
  }
  func.func @transform_15(%arg0: i32) -> (i32, i32) {
    %c0_i32 = arith.constant 0 : i32
    %c0_i32_0 = arith.constant 0 : i32
    %c0_i32_1 = arith.constant 0 : i32
    return %c0_i32, %c0_i32_0 : i32, i32
  }
  func.func @transform_16(%arg0: i32) -> (i32, i32) {
    %c0_i32 = arith.constant 0 : i32
    %c0_i32_0 = arith.constant 0 : i32
    %c0_i32_1 = arith.constant 0 : i32
    return %c0_i32, %c0_i32_0 : i32, i32
  }
  func.func @transform_17(%arg0: i32) -> (i32, i32) {
    %c0_i32 = arith.constant 0 : i32
    %c0_i32_0 = arith.constant 0 : i32
    %c0_i32_1 = arith.constant 0 : i32
    return %c0_i32, %c0_i32_0 : i32, i32
  }
  func.func @transform_18(%arg0: i32) -> (i32, i32, i32) {
    %c0_i32 = arith.constant 0 : i32
    %c0_i32_0 = arith.constant 0 : i32
    %c0_i32_1 = arith.constant 0 : i32
    return %arg0, %c0_i32, %c0_i32_0 : i32, i32, i32
  }
}

</mosaic_0001>

<bundles_post_ra>
// kernel: tpu_custom_call.1
= control target key start
LH: loop header
LB: loop body
LE: loop exit
PB: predicated region body
PF: predicated region fallthrough
CT: control target
= control target key end

     0   :  { %s5496_s0 = inlined_call_operand.vmem [shape: f32[2,16,4], index: 0, kind: input, shape index: {}]   ;;  %s5497_s1 = inlined_call_operand.vmem [shape: f32[4,64], index: 1, kind: input, shape index: {}]   ;;  %s5498_s2 = inlined_call_operand.vmem [shape: f32[1,64], index: 2, kind: input, shape index: {}]   ;;  %s5499_s3 = inlined_call_operand.vmem [shape: f32[1,64], index: 3, kind: input, shape index: {}]   ;;  %s5500_s4 = inlined_call_operand.vmem [shape: bf16[64,128], index: 4, kind: input, shape index: {}]   ;;  %s5501_s5 = inlined_call_operand.vmem [shape: f32[1,128], index: 5, kind: input, shape index: {}]   ;;  %s5502_s6 = inlined_call_operand.vmem [shape: f32[1,128], index: 6, kind: input, shape index: {}]   ;;  %s5503_s7 = inlined_call_operand.hbm [shape: bf16[128,1024], index: 7, kind: input, shape index: {}]   ;;  %s5504_s8 = inlined_call_operand.vmem [shape: f32[1,1024], index: 8, kind: input, shape index: {}]   ;;  %s5505_s9 = inlined_call_operand.vmem [shape: f32[1,1024], index: 9, kind: input, shape index: {}]   ;;  %s5506_s10 = inlined_call_operand.hbm [shape: bf16[1024,512], index: 10, kind: input, shape index: {}]   ;;  %s5507_s11 = inlined_call_operand.vmem [shape: f32[1,512], index: 11, kind: input, shape index: {}]   ;;  %s5508_s12 = inlined_call_operand.vmem [shape: f32[1,512], index: 12, kind: input, shape index: {}]   ;;  %s5509_s13 = inlined_call_operand.hbm [shape: bf16[512,256], index: 13, kind: input, shape index: {}]   ;;  %s5510_s14 = inlined_call_operand.vmem [shape: f32[1,256], index: 14, kind: input, shape index: {}]   ;;  %s5511_s15 = inlined_call_operand.vmem [shape: f32[1,256], index: 15, kind: input, shape index: {}]   ;;  %s5512_s16 = inlined_call_operand.vmem [shape: f32[256,9], index: 16, kind: input, shape index: {}]   ;;  %s5513_s17 = inlined_call_operand.vmem [shape: f32[1,9], index: 17, kind: input, shape index: {}]   ;;  %s5514_s18 = inlined_call_operand.hbm [shape: f32[1,2,9], index: 18, kind: output, shape index: {}]  }
   0x1   :  { %5517 = sst [smem:[#allocation12_spill]] %s5496_s0 }
   0x2   :  { %5518 = sst [smem:[#allocation13_spill]] %s5497_s1 }
   0x3   :  { %5519 = sst [smem:[#allocation14_spill]] %s5498_s2 }
   0x4   :  { %23 = vsyncpa [#allocation3], 0 }
   0x5   :  { %24 = vsyncpa [#allocation6], 0 }
   0x6   :  { %25 = vsyncpa [#allocation4], 0  ;;  %s4937_s27 = smov [#allocation5]  }
   0x7   :  { %s61_s28 = sshll.u32 %s4937_s27, 4  ;;  %s62_s28 = int_to_ptr.vmem [resolvable:$true] %s61_s28 }
   0x8   :  { %s4859_s29 = scalar_lea.vmem %s62_s28, 32768  ;;  %p4864_p1 = scmp.lt.s32.totalorder %s62_s28, %s62_s28 }
   0x9   :  { %p4860_p0 = scmp.ne.s32.totalorder %s62_s28, %s4859_s29  ;;  %p4865_p2 = scmp.lt.s32.totalorder %s4859_s29, %s4859_s29 }
   0xb   :  { %p4866_p3 = por %p4865_p2, %p4864_p1 }
   0xd   :  { %p4867_p4 = pnand %p4866_p3, %p4860_p0 }
   0xf   :  { %4870 = shalt.err (!%p4867_p4)
}
  0x10   :  { %s4938_s30 = smov 256   ;;  %s4939_s0 = smov 16  }
  0x11   :  { %67 = dma.hbm_to_vmem [thread:$0]  %s5506_s10, 32768, %s62_s28, [#allocation6], %s4938_s30, %s4938_s30, %s4939_s0  }
  0x12   :  { %s4940_s20 = smov [#allocation2]  }
  0x13   :  { %s45_s21 = sshll.u32 %s4940_s20, 4  ;;  %s46_s21 = int_to_ptr.vmem [resolvable:$true] %s45_s21 }
  0x14   :  { %s4879_s22 = scalar_lea.vmem %s46_s21, 8192  ;;  %p4884_p6 = scmp.lt.s32.totalorder %s46_s21, %s46_s21 }
  0x15   :  { %p4880_p5 = scmp.ne.s32.totalorder %s46_s21, %s4879_s22  ;;  %p4885_p7 = scmp.lt.s32.totalorder %s4879_s22, %s4879_s22 }
  0x17   :  { %p4886_p8 = por %p4885_p7, %p4884_p6 }
  0x19   :  { %p4887_p9 = pnand %p4886_p8, %p4880_p5 }
  0x1b   :  { %4890 = shalt.err (!%p4887_p9)
}
  0x1c   :  { %s4941_s2 = smov 512   ;;  %s4942_s23 = smov 32  }
  0x1d   :  { %51 = dma.hbm_to_vmem [thread:$0]  %s5503_s7, 8192, %s46_s21, [#allocation3], %s4941_s2, %s4941_s2, %s4942_s23  }
  0x1e   :  { %s4943_s26 = smov [#allocation7]  }
  0x1f   :  { %s77_s27 = sshll.u32 %s4943_s26, 4  ;;  %s78_s27 = int_to_ptr.vmem [resolvable:$true] %s77_s27 }
  0x20   :  { %s4899_s10 = scalar_lea.vmem %s78_s27, 8192  ;;  %p4904_p11 = scmp.lt.s32.totalorder %s78_s27, %s78_s27 }
  0x21   :  { %p4900_p10 = scmp.ne.s32.totalorder %s78_s27, %s4899_s10  ;;  %p4905_p12 = scmp.lt.s32.totalorder %s4899_s10, %s4899_s10 }
  0x23   :  { %p4906_p13 = por %p4905_p12, %p4904_p11 }
  0x25   :  { %p4907_p0 = pnand %p4906_p13, %p4900_p10 }
  0x27   :  { %4910 = shalt.err (!%p4907_p0)
}
  0x28   :  { %s4944_s28 = smov 128   ;;  %s4945_s29 = smov 8  }
  0x29   :  { %83 = dma.hbm_to_vmem [thread:$0]  %s5509_s13, 8192, %s78_s27, [#allocation6], %s4944_s28, %s4944_s28, %s4945_s29  }
  0x2a   :  { %4931 = dma.done.wait [#allocation3], 8192  }
  0x2b   :  { %4932 = vsyncadd [#allocation3], 4294959104 }
  0x2c   :  { %4933 = dma.done.wait [#allocation6], 40960  }
  0x2d   :  { %4934 = vsyncadd [#allocation6], 4294926336  ;;  %v4946_v0 = vmov 1   ;;  %v4947_v1 = vmov 0   ;;  %s5520_s1 = sld [smem:[#allocation12_spill]]  ;;  %v4948_v6 = vmov 2  }
  0x2e   :  { %4359 = vset.pattern.permute.xlu1 %v4946_v0  ;;  %4358 = vset.pattern.permute.xlu0 %v4947_v1  ;;  %v4949_v7 = vmov 3   ;;  %v4367_v8 = vld [vmem:[%s5500_s4 + $0x18] sm:$0xff]   ;;  %v4368_v9 = vld [vmem:[%s5500_s4 + $0x10] sm:$0xff]   ;;  %v4369_v10 = vld [vmem:[%s5500_s4 + $0x8] sm:$0xff]   ;;  %s5521_s7 = sld [smem:[#allocation13_spill]]  ;;  %vm282_vm0 = vcmask 523264  }
  0x2f   :  { %782 = vmatprep.mubr.bf16.mxu1 %v4947_v1  ;;  %4331 = vmatprep.subr.bf16.mxu0 %v4367_v8  ;;  %v4370_v11 = vld [vmem:[%s5500_s4] sm:$0xff]   ;;  %v5083_v14 = vld [vmem:[#allocation2 + $0x1c8] sm:$0xff]  ;;  %s5522_s24 = sld [smem:[#allocation14_spill]]  ;;  %vm1558_vm1 = vcmask 1041409   ;;  %vm3873_vm3 = vcmask 66560  }
  0x30   :  { %4332 = vmatpush3.bf16.msra.mxu0 %v4367_v8  ;;  %v422_v12 = vld [vmem:[#allocation2 + $0x1c0] sm:$0xff]  ;;  %v5085_v16 = vld [vmem:[#allocation2 + $0x1e8] sm:$0xff] }
  0x31   :  { %4333 = vmatprep.subr.bf16.mxu0 %v4368_v9  ;;  %v426_v13 = vld [vmem:[#allocation2 + $0x1e0] sm:$0xff]  ;;  %v3963_v20 = vcombine.low %v5083_v14, %v5085_v16  ;;  %v3964_v21 = vcombine.high %v5083_v14, %v5085_v16 }
  0x32   :  { %v3962_v15 = vcombine.high %v422_v12, %v426_v13  ;;  %v3961_v17 = vcombine.low %v422_v12, %v426_v13  ;;  %v414_v18 = vld [vmem:[#allocation2 + $0x180] sm:$0xff] }
  0x33   :  { %v102_v2 = vld [vmem:[%s5520_s1] sm:$0xff]  ;;  %v103_v3 = vld [vmem:[%s5520_s1 + $0x8] sm:$0xff]  ;;  %v104_v4 = vld [vmem:[%s5520_s1 + $0x10] sm:$0xff] }
  0x34   :  { %137 = vperm.xlu1 %4359, %v102_v2   ;;  %109 = vperm.xlu0 %4358, %v102_v2   ;;  %v105_v5 = vld [vmem:[%s5520_s1 + $0x18] sm:$0xff]  ;;  %v418_v19 = vld [vmem:[#allocation2 + $0x1a0] sm:$0xff] }
  0x35   :  { %4334 = vmatpush3.bf16.msra.mxu0 %v4368_v9  ;;  %v3954_v22 = vcombine.high %v414_v18, %v418_v19  ;;  %750 = vmatprep.subr.bf16.mxu1 %v3962_v15  ;;  %v3953_v23 = vcombine.low %v414_v18, %v418_v19  ;;  %v406_v24 = vld [vmem:[#allocation2 + $0x140] sm:$0xff] }
  0x36   :  { %4335 = vmatprep.subr.bf16.mxu0 %v4369_v10  ;;  %751 = vmatpush1.bf16.msra.mxu1 %v3961_v17  ;;  %v410_v25 = vld [vmem:[#allocation2 + $0x160] sm:$0xff] }
  0x37   :  { %752 = vmatprep.subr.bf16.mxu1 %v3954_v22  ;;  %v3946_v26 = vcombine.high %v406_v24, %v410_v25  ;;  %v3945_v27 = vcombine.low %v406_v24, %v410_v25  ;;  %v398_v28 = vld [vmem:[#allocation2 + $0x100] sm:$0xff] }
  0x38   :  { %141 = vperm.xlu1 %4359, %v103_v3   ;;  %114 = vperm.xlu0 %4358, %v103_v3   ;;  %v402_v29 = vld [vmem:[#allocation2 + $0x120] sm:$0xff] }
  0x39   :  { %4336 = vmatpush3.bf16.msra.mxu0 %v4369_v10  ;;  %v3938_v30 = vcombine.high %v398_v28, %v402_v29  ;;  %v3937_v31 = vcombine.low %v398_v28, %v402_v29  ;;  %v390_v32 = vld [vmem:[#allocation2 + $0xc0] sm:$0xff] }
  0x3a   :  { %4337 = vmatprep.subr.bf16.mxu0 %v4370_v11  ;;  %753 = vmatpush1.bf16.msra.mxu1 %v3953_v23  ;;  %v394_v33 = vld [vmem:[#allocation2 + $0xe0] sm:$0xff] }
  0x3b   :  { %754 = vmatprep.subr.bf16.mxu1 %v3946_v26  ;;  %v3930_v34 = vcombine.high %v390_v32, %v394_v33  ;;  %v3929_v35 = vcombine.low %v390_v32, %v394_v33  ;;  %v3892_v44 = vld [vmem:[%s5521_s7 + $0x1] ss:$0 sm:$0xff]  ;;  %v3891_v45 = vld [vmem:[%s5521_s7] ss:$0 sm:$0xff]  ;;  %v3893_v48 = vld [vmem:[%s5521_s7 + $0x2] ss:$0 sm:$0xff] }
  0x3c   :  { %4360 = vset.pattern.permute.xlu1 %v4947_v1  ;;  %119 = vperm.xlu0 %4358, %v104_v4   ;;  %v3894_v51 = vld [vmem:[%s5521_s7 + $0x3] ss:$0 sm:$0xff] }
  0x3d   :  { %124 = vperm.xlu1 %4360, %v105_v5   ;;  %4338 = vmatpush3.bf16.msra.mxu0 %v4370_v11  ;;  %v382_v16 = vld [vmem:[#allocation2 + $0x80] sm:$0xff] }
  0x3e   :  { %803 = vmatprep.subr.bf16.mxu0 %v3964_v21  ;;  %755 = vmatpush1.bf16.msra.mxu1 %v3945_v27  ;;  %v3896_v21 = vld [vmem:[%s5499_s3] ss:$0 sm:$0xff] }
  0x3f   :  { %756 = vmatprep.subr.bf16.mxu1 %v3938_v30 }
  0x40   :  { %4361 = vset.pattern.permute.xlu0 %v4946_v0 }
  0x41   :  { %4362 = vset.pattern.permute.xlu1 %v4946_v0  ;;  %145 = vperm.xlu0 %4361, %v104_v4  }
  0x42   :  { %149 = vperm.xlu1 %4362, %v105_v5   ;;  %757 = vmatpush1.bf16.msra.mxu1 %v3937_v31 }
  0x43   :  { %758 = vmatprep.subr.bf16.mxu1 %v3930_v34 }
  0x45   :  { %4364 = vset.pattern.permute.xlu0 %v4948_v6 }
  0x46   :  { %4363 = vset.pattern.permute.xlu1 %v4948_v6  ;;  %170 = vperm.xlu0 %4364, %v103_v3  }
  0x47   :  { %166 = vperm.xlu1 %4363, %v102_v2   ;;  %759 = vmatpush1.bf16.msra.mxu1 %v3929_v35 }
  0x4a   :  { %4365 = vset.pattern.permute.xlu0 %v4949_v7 }
  0x4b   :  { %174 = vperm.xlu1 %4363, %v104_v4   ;;  %195 = vperm.xlu0 %4365, %v102_v2  }
  0x4f   :  { %178 = vperm.xlu1 %4363, %v105_v5   ;;  %207 = vperm.xlu0 %4365, %v105_v5  }
  0x53   :  { %4366 = vset.pattern.permute.xlu1 %v4949_v7  ;;  %v3895_v7 = vld [vmem:[%s5522_s24] ss:$0 sm:$0xff] }
  0x54   :  { %199 = vperm.xlu1 %4366, %v103_v3  }
  0x58   :  { %203 = vperm.xlu1 %4366, %v104_v4  }
  0xaf   :  { %v138_v36 = vpop.permute.xlu1 %137  ;;  %v110_v37 = vpop.permute.xlu0 %109 }
  0xb0   :  { %v156_v49 = vmul.f32 %v3892_v44, %v138_v36  ;;  %v131_v50 = vmul.f32 %v3891_v45, %v110_v37  ;;  %v415_v37 = vld [vmem:[#allocation2 + $0x188] sm:$0xff] }
  0xb2   :  { %v160_v56 = vadd.f32 %v156_v49, %v131_v50 }
  0xb3   :  { %v142_v38 = vpop.permute.xlu1 %141  ;;  %v115_v39 = vpop.permute.xlu0 %114 }
  0xb4   :  { %v157_v59 = vmul.f32 %v3892_v44, %v142_v38  ;;  %v132_v60 = vmul.f32 %v3891_v45, %v115_v39  ;;  %v419_v38 = vld [vmem:[#allocation2 + $0x1a8] sm:$0xff] }
  0xb6   :  { %v161_v9 = vadd.f32 %v157_v59, %v132_v60 }
  0xb7   :  { %v120_v40 = vpop.permute.xlu0 %119 }
  0xb8   :  { %v125_v41 = vpop.permute.xlu1 %124  ;;  %v133_v10 = vmul.f32 %v3891_v45, %v120_v40 }
  0xb9   :  { %v134_v58 = vmul.f32 %v3891_v45, %v125_v41  ;;  %v3955_v45 = vcombine.low %v415_v37, %v419_v38 }
  0xbc   :  { %v146_v42 = vpop.permute.xlu0 %145 }
  0xbd   :  { %v150_v43 = vpop.permute.xlu1 %149  ;;  %v158_v6 = vmul.f32 %v3892_v44, %v146_v42  ;;  %v3956_v42 = vcombine.high %v415_v37, %v419_v38  ;;  %v420_v37 = vld [vmem:[#allocation2 + $0x1b0] sm:$0xff]  ;;  %v417_v38 = vld [vmem:[#allocation2 + $0x198] sm:$0xff] }
  0xbe   :  { %v159_v55 = vmul.f32 %v3892_v44, %v150_v43  ;;  %v407_v43 = vld [vmem:[#allocation2 + $0x148] sm:$0xff] }
  0xbf   :  { %v162_v19 = vadd.f32 %v158_v6, %v133_v10  ;;  %v411_v44 = vld [vmem:[#allocation2 + $0x168] sm:$0xff]  ;;  %v366_v6 = vld [vmem:[#allocation2] sm:$0xff] }
  0xc0   :  { %v163_v0 = vadd.f32 %v159_v55, %v134_v58  ;;  %v3947_v49 = vcombine.low %v407_v43, %v411_v44  ;;  %v383_v55 = vld [vmem:[#allocation2 + $0x88] sm:$0xff] }
  0xc1   :  { %v171_v46 = vpop.permute.xlu0 %170  ;;  %v371_v10 = vld [vmem:[#allocation2 + $0x28] sm:$0xff] }
  0xc2   :  { %v167_v47 = vpop.permute.xlu1 %166  ;;  %v186_v3 = vmul.f32 %v3893_v48, %v171_v46  ;;  %v3948_v46 = vcombine.high %v407_v43, %v411_v44 }
  0xc3   :  { %v185_v52 = vmul.f32 %v3893_v48, %v167_v47  ;;  %v399_v47 = vld [vmem:[#allocation2 + $0x108] sm:$0xff] }
  0xc4   :  { %v190_v13 = vadd.f32 %v186_v3, %v161_v9 }
  0xc5   :  { %v189_v61 = vadd.f32 %v185_v52, %v160_v56  ;;  %v395_v52 = vld [vmem:[#allocation2 + $0xe8] sm:$0xff] }
  0xc6   :  { %v175_v53 = vpop.permute.xlu1 %174  ;;  %v196_v54 = vpop.permute.xlu0 %195 }
  0xc7   :  { %v214_v57 = vmul.f32 %v3894_v51, %v196_v54  ;;  %v187_v11 = vmul.f32 %v3893_v48, %v175_v53 }
  0xc9   :  { %v218_v4 = vadd.f32 %v214_v57, %v189_v61  ;;  %v191_v23 = vadd.f32 %v187_v11, %v162_v19  ;;  %v387_v57 = vld [vmem:[#allocation2 + $0xa8] sm:$0xff]  ;;  %v374_v61 = vld [vmem:[#allocation2 + $0x40] sm:$0xff] }
  0xca   :  { %v179_v62 = vpop.permute.xlu1 %178  ;;  %v208_v63 = vpop.permute.xlu0 %207  ;;  %v3923_v58 = vcombine.low %v383_v55, %v387_v57  ;;  %v3924_v59 = vcombine.high %v383_v55, %v387_v57  ;;  %v404_v55 = vld [vmem:[#allocation2 + $0x130] sm:$0xff]  ;;  %v405_v57 = vld [vmem:[#allocation2 + $0x138] sm:$0xff] }
  0xcb   :  { %v188_v2 = vmul.f32 %v3893_v48, %v179_v62  ;;  %v217_v5 = vmul.f32 %v3894_v51, %v208_v63  ;;  %v229_v15 = vmul.f32 %v3895_v7, %v218_v4  ;;  %v403_v48 = vld [vmem:[#allocation2 + $0x128] sm:$0xff]  ;;  %v378_v62 = vld [vmem:[#allocation2 + $0x60] sm:$0xff] }
  0xcc   :  { %v3940_v50 = vcombine.high %v399_v47, %v403_v48  ;;  %v3939_v53 = vcombine.low %v399_v47, %v403_v48  ;;  %v375_v63 = vld [vmem:[#allocation2 + $0x48] sm:$0xff]  ;;  %v408_v47 = vld [vmem:[#allocation2 + $0x150] sm:$0xff] }
  0xcd   :  { %v192_v8 = vadd.f32 %v188_v2, %v163_v0  ;;  %v240_v28 = vadd.f32 %v3896_v21, %v229_v15  ;;  %v3914_v0 = vcombine.high %v374_v61, %v378_v62  ;;  %v379_v2 = vld [vmem:[#allocation2 + $0x68] sm:$0xff]  ;;  %v424_v15 = vld [vmem:[#allocation2 + $0x1d0] sm:$0xff] }
  0xce   :  { %v3915_v3 = vcombine.low %v375_v63, %v379_v2  ;;  %v3916_v4 = vcombine.high %v375_v63, %v379_v2  ;;  %v412_v48 = vld [vmem:[#allocation2 + $0x170] sm:$0xff] }
  0xcf   :  { %v200_v12 = vpop.permute.xlu1 %199  ;;  %v221_v17 = vadd.f32 %v217_v5, %v192_v8  ;;  %v244_v33 = vmax.f32 %v240_v28, 0.0  ;;  %v3913_v5 = vcombine.low %v374_v61, %v378_v62  ;;  %v367_v8 = vld [vmem:[#allocation2 + $0x8] sm:$0xff]  ;;  %v396_v2 = vld [vmem:[#allocation2 + $0xf0] sm:$0xff] }
  0xd0   :  { %v215_v18 = vmul.f32 %v3894_v51, %v200_v12  ;;  %v3907_v11 = vcombine.low %v367_v8, %v371_v10  ;;  %v3908_v12 = vcombine.high %v367_v8, %v371_v10  ;;  %v388_v10 = vld [vmem:[#allocation2 + $0xb0] sm:$0xff] }
  0xd1   :  { %v232_v25 = vmul.f32 %v3895_v7, %v221_v17  ;;  %v428_v17 = vld [vmem:[#allocation2 + $0x1f0] sm:$0xff] }
  0xd2   :  { %v219_v22 = vadd.f32 %v215_v18, %v190_v13  ;;  %v425_v18 = vld [vmem:[#allocation2 + $0x1d8] sm:$0xff]  ;;  %v3966_v19 = vcombine.high %v424_v15, %v428_v17 }
  0xd3   :  { %v204_v24 = vpop.permute.xlu1 %203  ;;  %v243_v31 = vadd.f32 %v3896_v21, %v232_v25 }
  0xd4   :  { %v230_v26 = vmul.f32 %v3895_v7, %v219_v22  ;;  %v216_v27 = vmul.f32 %v3894_v51, %v204_v24  ;;  %v391_v51 = vld [vmem:[#allocation2 + $0xc8] sm:$0xff]  ;;  %v3965_v22 = vcombine.low %v424_v15, %v428_v17 }
  0xd5   :  { %v247_v39 = vmax.f32 %v243_v31, 0.0  ;;  %v3932_v54 = vcombine.high %v391_v51, %v395_v52  ;;  %v3931_v14 = vcombine.low %v391_v51, %v395_v52 }
  0xd6   :  { %v220_v29 = vadd.f32 %v216_v27, %v191_v23  ;;  %v241_v30 = vadd.f32 %v3896_v21, %v230_v26  ;;  %v3903_v26 = vld [vmem:[%s5501_s5] ss:$0 sm:$0xff] }
  0xd8   :  { %v231_v32 = vmul.f32 %v3895_v7, %v220_v29  ;;  %v245_v34 = vmax.f32 %v241_v30, 0.0  ;;  %v370_v7 = vld [vmem:[#allocation2 + $0x20] sm:$0xff] }
  0xd9   :  { %v3906_v9 = vcombine.high %v366_v6, %v370_v7  ;;  %v3905_v13 = vcombine.low %v366_v6, %v370_v7  ;;  %v3904_v30 = vld [vmem:[%s5502_s6] ss:$0 sm:$0xff] }
  0xda   :  { %v242_v35 = vadd.f32 %v3896_v21, %v231_v32  ;;  %v248_v36 = vpack.c.bf16 %v245_v34, %v244_v33  ;;  %v429_v21 = vld [vmem:[#allocation2 + $0x1f8] sm:$0xff] }
  0xdb   :  { %v3967_v23 = vcombine.low %v425_v18, %v429_v21  ;;  %v3968_v24 = vcombine.high %v425_v18, %v429_v21  ;;  %v380_v21 = vld [vmem:[#allocation2 + $0x70] sm:$0xff] }
  0xdc   :  { %v246_v40 = vmax.f32 %v242_v35, 0.0  ;;  %4339 = vmatprep.mubr.msk.bf16.mxu0 %vm282_vm0, %v248_v36  ;;  %v416_v36 = vld [vmem:[#allocation2 + $0x190] sm:$0xff] }
  0xdd   :  { %v3957_v52 = vcombine.low %v416_v36, %v420_v37 }
  0xde   :  { %v249_v41 = vpack.c.bf16 %v247_v39, %v246_v40  ;;  %v421_v39 = vld [vmem:[#allocation2 + $0x1b8] sm:$0xff] }
  0xe0   :  { %4340 = vmatmul.mubr.msk.bf16.vlgmr.msra.gmra.mxu0 %vm282_vm0, %v249_v41 }
  0xe1   :  { %804 = vmatpush1.bf16.msra.mxu0 %v3963_v20  ;;  %835 = vmatprep.mubr.bf16.mxu0 %v4947_v1  ;;  %v386_v20 = vld [vmem:[#allocation2 + $0xa0] sm:$0xff] }
  0xe2   :  { %805 = vmatprep.subr.bf16.mxu0 %v3956_v42  ;;  %v3922_v56 = vcombine.high %v382_v16, %v386_v20  ;;  %v3921_v60 = vcombine.low %v382_v16, %v386_v20  ;;  %v400_v20 = vld [vmem:[#allocation2 + $0x110] sm:$0xff] }
  0xe3   :  { %v3942_v62 = vcombine.high %v400_v20, %v404_v55 }
  0xe4   :  { %760 = vmatprep.subr.bf16.mxu1 %v3922_v56  ;;  %v401_v56 = vld [vmem:[#allocation2 + $0x118] sm:$0xff] }
  0xe5   :  { %806 = vmatpush1.bf16.msra.mxu0 %v3955_v45  ;;  %761 = vmatpush1.bf16.msra.mxu1 %v3921_v60  ;;  %v3958_v45 = vcombine.high %v416_v36, %v420_v37  ;;  %v3944_v63 = vcombine.high %v401_v56, %v405_v57  ;;  %v3943_v6 = vcombine.low %v401_v56, %v405_v57  ;;  %v4401_v56 = vld [vmem:[#allocation5 + $0x40] ss:$16 sps:$4 sm:$0xff]  }
  0xe6   :  { %807 = vmatprep.subr.bf16.mxu0 %v3948_v46  ;;  %762 = vmatprep.subr.bf16.mxu1 %v3914_v0  ;;  %v3960_v46 = vcombine.high %v417_v38, %v421_v39  ;;  %v392_v0 = vld [vmem:[#allocation2 + $0xd0] sm:$0xff] }
  0xe7   :  { %v3934_v7 = vcombine.high %v392_v0, %v396_v2  ;;  %v4404_v57 = vld [vmem:[#allocation5 + $0x240] ss:$16 sps:$4 sm:$0xff]  }
  0xe9   :  { %808 = vmatpush1.bf16.msra.mxu0 %v3947_v49  ;;  %763 = vmatpush1.bf16.msra.mxu1 %v3913_v5  ;;  %v409_v49 = vld [vmem:[#allocation2 + $0x158] sm:$0xff]  ;;  %v3941_v5 = vcombine.low %v400_v20, %v404_v55  ;;  %v4403_v20 = vld [vmem:[#allocation5 + $0x44] ss:$16 sps:$4 sm:$0xff]  }
  0xea   :  { %809 = vmatprep.subr.bf16.mxu0 %v3940_v50  ;;  %764 = vmatprep.subr.bf16.mxu1 %v3906_v9  ;;  %v413_v50 = vld [vmem:[#allocation2 + $0x178] sm:$0xff]  ;;  %v384_v9 = vld [vmem:[#allocation2 + $0x90] sm:$0xff] }
  0xeb   :  { %v3952_v16 = vcombine.high %v409_v49, %v413_v50  ;;  %v3951_v60 = vcombine.low %v409_v49, %v413_v50  ;;  %v3926_v17 = vcombine.high %v384_v9, %v388_v10  ;;  %v4383_v49 = vld [vmem:[#allocation5 + $0xa0] ss:$16 sps:$4 sm:$0xff]   ;;  %v4406_v55 = vld [vmem:[#allocation5 + $0x244] ss:$16 sps:$4 sm:$0xff]  }
  0xec   :  { %v4386_v50 = vld [vmem:[#allocation5 + $0x2a0] ss:$16 sps:$4 sm:$0xff]  }
  0xed   :  { %810 = vmatpush1.bf16.msra.mxu0 %v3939_v53  ;;  %765 = vmatpush1.bf16.msra.mxu1 %v3905_v13  ;;  %v3959_v53 = vcombine.low %v417_v38, %v421_v39  ;;  %v3933_v13 = vcombine.low %v392_v0, %v396_v2  ;;  %v4373_v38 = vld [vmem:[#allocation5 + $0xe4] ss:$16 sps:$4 sm:$0xff]   ;;  %v4413_v0 = vld [vmem:[#allocation5] ss:$16 sps:$4 sm:$0xff]  }
  0xee   :  { %811 = vmatprep.subr.bf16.mxu0 %v3932_v54  ;;  %856 = vmatprep.subr.bf16.mxu1 %v3966_v19  ;;  %v376_v19 = vld [vmem:[#allocation2 + $0x50] sm:$0xff] }
  0xef   :  { %v4376_v39 = vld [vmem:[#allocation5 + $0x2e4] ss:$16 sps:$4 sm:$0xff]   ;;  %v4416_v2 = vld [vmem:[#allocation5 + $0x200] ss:$16 sps:$4 sm:$0xff]  }
  0xf1   :  { %812 = vmatpush1.bf16.msra.mxu0 %v3931_v14  ;;  %v3950_v14 = vcombine.high %v408_v47, %v412_v48 }
  0xf2   :  { %813 = vmatprep.subr.bf16.mxu0 %v3924_v59  ;;  %v3949_v59 = vcombine.low %v408_v47, %v412_v48  ;;  %v4385_v47 = vld [vmem:[#allocation5 + $0xa4] ss:$16 sps:$4 sm:$0xff]  }
  0xf3   :  { %v4388_v48 = vld [vmem:[#allocation5 + $0x2a4] ss:$16 sps:$4 sm:$0xff]  }
  0xf5   :  { %814 = vmatpush1.bf16.msra.mxu0 %v3923_v58 }
  0xf6   :  { %815 = vmatprep.subr.bf16.mxu0 %v3916_v4  ;;  %v397_v4 = vld [vmem:[#allocation2 + $0xf8] sm:$0xff] }
  0xf9   :  { %816 = vmatpush1.bf16.msra.mxu0 %v3915_v3  ;;  %v393_v3 = vld [vmem:[#allocation2 + $0xd8] sm:$0xff] }
  0xfa   :  { %817 = vmatprep.subr.bf16.mxu0 %v3908_v12  ;;  %v3936_v8 = vcombine.high %v393_v3, %v397_v4  ;;  %v389_v12 = vld [vmem:[#allocation2 + $0xb8] sm:$0xff]  ;;  %v3935_v15 = vcombine.low %v393_v3, %v397_v4  ;;  %v4421_v3 = vld [vmem:[#allocation5 + $0x1e4] ss:$16 sps:$4 sm:$0xff]  }
  0xfb   :  { %v4424_v4 = vld [vmem:[#allocation5 + $0x3e4] ss:$16 sps:$4 sm:$0xff]  }
  0xfd   :  { %818 = vmatpush1.bf16.msra.mxu0 %v3907_v11  ;;  %v385_v11 = vld [vmem:[#allocation2 + $0x98] sm:$0xff] }
  0xfe   :  { %909 = vmatprep.subr.bf16.mxu0 %v3968_v24  ;;  %v3928_v18 = vcombine.high %v385_v11, %v389_v12  ;;  %v3925_v24 = vcombine.low %v384_v9, %v388_v10  ;;  %v4425_v9 = vld [vmem:[#allocation5 + $0x1c0] ss:$16 sps:$4 sm:$0xff]  }
  0xff   :  { %v4428_v10 = vld [vmem:[#allocation5 + $0x3c0] ss:$16 sps:$4 sm:$0xff]  }
 0x1a0   :  { %v4341_v25 = vpop.f32.mrf.mxu0 }
 0x1a1   :  { %v347_v40 = vmul.f32 %v4341_v25, %v3903_v26  ;;  %v3927_v25 = vcombine.low %v385_v11, %v389_v12  ;;  %v4433_v11 = vld [vmem:[#allocation5 + $0x1a4] ss:$16 sps:$4 sm:$0xff]  }
 0x1a2   :  { %v323_v27 = vpop.f32.mrf.mxu0  ;;  %v4436_v12 = vld [vmem:[#allocation5 + $0x3a4] ss:$16 sps:$4 sm:$0xff]  }
 0x1a3   :  { %v345_v28 = vmul.f32 %v3903_v26, %v323_v27  ;;  %v358_v51 = vadd.f32 %v3904_v30, %v347_v40  ;;  %v4371_v40 = vld [vmem:[#allocation5 + $0xe0] ss:$16 sps:$4 sm:$0xff]  }
 0x1a4   :  { %v4342_v29 = vpop.f32.mrf.mxu0 }
 0x1a5   :  { %v356_v32 = vadd.f32 %v3904_v30, %v345_v28  ;;  %v348_v34 = vmul.f32 %v4342_v29, %v3903_v26  ;;  %v362_v58 = vmax.f32 %v358_v51, 0.0  ;;  %v368_v28 = vld [vmem:[#allocation2 + $0x10] sm:$0xff] }
 0x1a6   :  { %v326_v31 = vpop.f32.mrf.mxu0  ;;  %v372_v29 = vld [vmem:[#allocation2 + $0x30] sm:$0xff] }
 0x1a7   :  { %v346_v33 = vmul.f32 %v3903_v26, %v326_v31  ;;  %v360_v41 = vmax.f32 %v356_v32, 0.0  ;;  %v359_v43 = vadd.f32 %v3904_v30, %v348_v34  ;;  %v3918_v26 = vcombine.high %v376_v19, %v380_v21  ;;  %v373_v31 = vld [vmem:[#allocation2 + $0x38] sm:$0xff]  ;;  %v4391_v51 = vld [vmem:[#allocation5 + $0x84] ss:$16 sps:$4 sm:$0xff]  }
 0x1a8   :  { %v3917_v32 = vcombine.low %v376_v19, %v380_v21  ;;  %v3910_v34 = vcombine.high %v368_v28, %v372_v29  ;;  %v3909_v36 = vcombine.low %v368_v28, %v372_v29  ;;  %v4437_v19 = vld [vmem:[#allocation5 + $0x180] ss:$16 sps:$4 sm:$0xff]   ;;  %v4451_v28 = vld [vmem:[#allocation5 + $0x144] ss:$16 sps:$4 sm:$0xff]  }
 0x1a9   :  { %v357_v35 = vadd.f32 %v3904_v30, %v346_v33  ;;  %v363_v54 = vmax.f32 %v359_v43, 0.0  ;;  %v369_v30 = vld [vmem:[#allocation2 + $0x18] sm:$0xff]  ;;  %v4382_v43 = vld [vmem:[#allocation5 + $0x2c4] ss:$16 sps:$4 sm:$0xff]   ;;  %v4440_v21 = vld [vmem:[#allocation5 + $0x380] ss:$16 sps:$4 sm:$0xff]  }
 0x1aa   :  { %v3911_v37 = vcombine.low %v369_v30, %v373_v31  ;;  %v4454_v29 = vld [vmem:[#allocation5 + $0x344] ss:$16 sps:$4 sm:$0xff]  }
 0x1ab   :  { %v361_v42 = vmax.f32 %v357_v35, 0.0  ;;  %v5125_v61 = vpack.c.bf16 %v363_v54, %v362_v58  ;;  %v3912_v35 = vcombine.high %v369_v30, %v373_v31  ;;  %v4400_v54 = vld [vmem:[#allocation5 + $0x264] ss:$16 sps:$4 sm:$0xff]  }
 0x1ac   :  { %v4409_v58 = vld [vmem:[#allocation5 + $0x24] ss:$16 sps:$4 sm:$0xff]  }
 0x1ad   :  { %v5119_v44 = vpack.c.bf16 %v361_v42, %v360_v41  ;;  %v4374_v41 = vld [vmem:[#allocation5 + $0x2e0] ss:$16 sps:$4 sm:$0xff]   ;;  %v4379_v42 = vld [vmem:[#allocation5 + $0xc4] ss:$16 sps:$4 sm:$0xff]  }
 0x1af   :  { %783 = vmatmul.mubr.bf16.vlgmr.msra.gmra.mxu1 %v5119_v44  ;;  %836 = vmatmul.mubr.bf16.vlgmr.msra.gmra.mxu0 %v5119_v44 }
 0x1b0   :  { %857 = vmatpush1.bf16.msra.mxu1 %v3965_v22  ;;  %910 = vmatpush1.bf16.msra.mxu0 %v3967_v23  ;;  %v377_v22 = vld [vmem:[#allocation2 + $0x58] sm:$0xff] }
 0x1b1   :  { %858 = vmatprep.subr.bf16.mxu1 %v3958_v45  ;;  %911 = vmatprep.subr.bf16.mxu0 %v3960_v46  ;;  %v381_v23 = vld [vmem:[#allocation2 + $0x78] sm:$0xff]  ;;  %v4377_v45 = vld [vmem:[#allocation5 + $0xc0] ss:$16 sps:$4 sm:$0xff]  }
 0x1b2   :  { %792 = vmatprep.mubr.bf16.mxu1 %v4947_v1  ;;  %845 = vmatprep.mubr.bf16.mxu0 %v4947_v1  ;;  %v3920_v27 = vcombine.high %v377_v22, %v381_v23  ;;  %v3919_v33 = vcombine.low %v377_v22, %v381_v23  ;;  %v4380_v46 = vld [vmem:[#allocation5 + $0x2c0] ss:$16 sps:$4 sm:$0xff]   ;;  %v964_v22 = vlaneseq  ;;  %v4445_v23 = vld [vmem:[#allocation5 + $0x164] ss:$16 sps:$4 sm:$0xff]  }
 0x1b4   :  { %859 = vmatpush1.bf16.msra.mxu1 %v3957_v52  ;;  %912 = vmatpush1.bf16.msra.mxu0 %v3959_v53  ;;  %v4392_v52 = vld [vmem:[#allocation5 + $0x280] ss:$16 sps:$4 sm:$0xff]   ;;  %v4397_v53 = vld [vmem:[#allocation5 + $0x64] ss:$16 sps:$4 sm:$0xff]  }
 0x1b5   :  { %860 = vmatprep.subr.bf16.mxu1 %v3950_v14  ;;  %913 = vmatprep.subr.bf16.mxu0 %v3952_v16  ;;  %v4395_v14 = vld [vmem:[#allocation5 + $0x60] ss:$16 sps:$4 sm:$0xff]  }
 0x1b6   :  { %v4398_v16 = vld [vmem:[#allocation5 + $0x260] ss:$16 sps:$4 sm:$0xff]  }
 0x1b7   :  { %793 = vmatmul.mubr.bf16.gmra.mxu1 %v5125_v61  ;;  %846 = vmatmul.mubr.bf16.gmra.mxu0 %v5125_v61 }
 0x1b8   :  { %861 = vmatpush1.bf16.msra.mxu1 %v3949_v59  ;;  %914 = vmatpush1.bf16.msra.mxu0 %v3951_v60  ;;  %v4412_v59 = vld [vmem:[#allocation5 + $0x224] ss:$16 sps:$4 sm:$0xff]   ;;  %v4407_v60 = vld [vmem:[#allocation5 + $0x20] ss:$16 sps:$4 sm:$0xff]  }
 0x1b9   :  { %862 = vmatprep.subr.bf16.mxu1 %v3942_v62  ;;  %915 = vmatprep.subr.bf16.mxu0 %v3944_v63  ;;  %v4415_v62 = vld [vmem:[#allocation5 + $0x4] ss:$16 sps:$4 sm:$0xff]  }
 0x1ba   :  { %888 = vmatprep.mubr.bf16.mxu1 %v4947_v1  ;;  %941 = vmatprep.mubr.bf16.mxu0 %v4947_v1  ;;  %v4418_v63 = vld [vmem:[#allocation5 + $0x204] ss:$16 sps:$4 sm:$0xff]  }
 0x1bc   :  { %863 = vmatpush1.bf16.msra.mxu1 %v3941_v5  ;;  %916 = vmatpush1.bf16.msra.mxu0 %v3943_v6  ;;  %v4419_v5 = vld [vmem:[#allocation5 + $0x1e0] ss:$16 sps:$4 sm:$0xff]  }
 0x1bd   :  { %864 = vmatprep.subr.bf16.mxu1 %v3934_v7  ;;  %917 = vmatprep.subr.bf16.mxu0 %v3936_v8  ;;  %v4422_v6 = vld [vmem:[#allocation5 + $0x3e0] ss:$16 sps:$4 sm:$0xff]   ;;  %v4427_v7 = vld [vmem:[#allocation5 + $0x1c4] ss:$16 sps:$4 sm:$0xff]  }
 0x1be   :  { %v4430_v8 = vld [vmem:[#allocation5 + $0x3c4] ss:$16 sps:$4 sm:$0xff]  }
 0x1c0   :  { %865 = vmatpush1.bf16.msra.mxu1 %v3933_v13  ;;  %918 = vmatpush1.bf16.msra.mxu0 %v3935_v15  ;;  %v4431_v13 = vld [vmem:[#allocation5 + $0x1a0] ss:$16 sps:$4 sm:$0xff]  }
 0x1c1   :  { %866 = vmatprep.subr.bf16.mxu1 %v3926_v17  ;;  %919 = vmatprep.subr.bf16.mxu0 %v3928_v18  ;;  %v4434_v15 = vld [vmem:[#allocation5 + $0x3a0] ss:$16 sps:$4 sm:$0xff]   ;;  %v4439_v17 = vld [vmem:[#allocation5 + $0x184] ss:$16 sps:$4 sm:$0xff]  }
 0x1c2   :  { %v4442_v18 = vld [vmem:[#allocation5 + $0x384] ss:$16 sps:$4 sm:$0xff]  }
 0x1c4   :  { %867 = vmatpush1.bf16.msra.mxu1 %v3925_v24  ;;  %920 = vmatpush1.bf16.msra.mxu0 %v3927_v25  ;;  %v4448_v24 = vld [vmem:[#allocation5 + $0x364] ss:$16 sps:$4 sm:$0xff]   ;;  %v4443_v25 = vld [vmem:[#allocation5 + $0x160] ss:$16 sps:$4 sm:$0xff]  }
 0x1c5   :  { %868 = vmatprep.subr.bf16.mxu1 %v3918_v26  ;;  %921 = vmatprep.subr.bf16.mxu0 %v3920_v27  ;;  %v4446_v26 = vld [vmem:[#allocation5 + $0x360] ss:$16 sps:$4 sm:$0xff]   ;;  %v5138_v27 = vshrl.u32 %v964_v22, 7 }
 0x1c7   :  { %v982_v30 = vsub.s32 4, %v5138_v27  ;;  %v990_v31 = vsub.s32 6, %v5138_v27 }
 0x1c8   :  { %869 = vmatpush1.bf16.msra.mxu1 %v3917_v32  ;;  %922 = vmatpush1.bf16.msra.mxu0 %v3919_v33  ;;  %v5145_v32 = vld [vmem:[%s5504_s8] sm:$0xff] }
 0x1c9   :  { %870 = vmatprep.subr.bf16.mxu1 %v3910_v34  ;;  %923 = vmatprep.subr.bf16.mxu0 %v3912_v35  ;;  %v4449_v33 = vld [vmem:[#allocation5 + $0x140] ss:$16 sps:$4 sm:$0xff]   ;;  %v5148_v35 = vrot.slane %v5145_v32, %v982_v30 }
 0x1ca   :  { %v4452_v34 = vld [vmem:[#allocation5 + $0x340] ss:$16 sps:$4 sm:$0xff]  }
 0x1cc   :  { %871 = vmatpush1.bf16.msra.mxu1 %v3909_v36  ;;  %924 = vmatpush1.bf16.msra.mxu0 %v3911_v37  ;;  %v5151_v36 = vrot.slane %v5145_v32, %v990_v31  ;;  %v5156_v37 = vld [vmem:[%s5505_s9] sm:$0xff] }
 0x1cd   :  { %2863 = vmatprep.subr.bf16.mxu1 %v4373_v38  ;;  %2904 = vmatprep.subr.bf16.mxu0 %v4376_v39  ;;  %v5159_v38 = vrot.slane %v5156_v37, %v982_v30  ;;  %v5162_v39 = vrot.slane %v5156_v37, %v990_v31 }
 0x1cf   :  { %889 = vmatmul.mubr.bf16.vlgmr.msra.gmra.mxu1 %v5119_v44  ;;  %942 = vmatmul.mubr.bf16.vlgmr.msra.gmra.mxu0 %v5119_v44  ;;  %v4394_v44 = vld [vmem:[#allocation5 + $0x284] ss:$16 sps:$4 sm:$0xff]  }
 0x1d0   :  { %898 = vmatprep.mubr.bf16.mxu1 %v4947_v1  ;;  %951 = vmatprep.mubr.bf16.mxu0 %v4947_v1  ;;  %v4389_v1 = vld [vmem:[#allocation5 + $0x80] ss:$16 sps:$4 sm:$0xff]  }
 0x1d1   :  { %2864 = vmatpush1.bf16.msra.mxu1 %v4371_v40  ;;  %2905 = vmatpush1.bf16.msra.mxu0 %v4374_v41  ;;  %v4457_v40 = vld [vmem:[#allocation5 + $0x124] ss:$16 sps:$4 sm:$0xff]  }
 0x1d2   :  { %2865 = vmatprep.subr.bf16.mxu1 %v4379_v42  ;;  %2906 = vmatprep.subr.bf16.mxu0 %v4382_v43  ;;  %v4460_v41 = vld [vmem:[#allocation5 + $0x324] ss:$16 sps:$4 sm:$0xff]   ;;  %v4455_v42 = vld [vmem:[#allocation5 + $0x120] ss:$16 sps:$4 sm:$0xff]  }
 0x1d3   :  { %v4458_v43 = vld [vmem:[#allocation5 + $0x320] ss:$16 sps:$4 sm:$0xff]  }
 0x1d5   :  { %2866 = vmatpush1.bf16.msra.mxu1 %v4377_v45  ;;  %2907 = vmatpush1.bf16.msra.mxu0 %v4380_v46  ;;  %v4463_v45 = vld [vmem:[#allocation5 + $0x104] ss:$16 sps:$4 sm:$0xff]  }
 0x1d6   :  { %2867 = vmatprep.subr.bf16.mxu1 %v4385_v47  ;;  %2908 = vmatprep.subr.bf16.mxu0 %v4388_v48  ;;  %v4466_v46 = vld [vmem:[#allocation5 + $0x304] ss:$16 sps:$4 sm:$0xff]   ;;  %v4461_v47 = vld [vmem:[#allocation5 + $0x100] ss:$16 sps:$4 sm:$0xff]  }
 0x1d7   :  { %899 = vmatmul.mubr.bf16.gmra.mxu1 %v5125_v61  ;;  %952 = vmatmul.mubr.bf16.gmra.mxu0 %v5125_v61  ;;  %v4410_v61 = vld [vmem:[#allocation5 + $0x220] ss:$16 sps:$4 sm:$0xff]  }
 0x1d8   :  { %v4464_v48 = vld [vmem:[#allocation5 + $0x300] ss:$16 sps:$4 sm:$0xff]  }
 0x1d9   :  { %2868 = vmatpush1.bf16.msra.mxu1 %v4383_v49  ;;  %2909 = vmatpush1.bf16.msra.mxu0 %v4386_v50  ;;  %v4469_v49 = vld [vmem:[#allocation5 + $0x4e4] ss:$16 sps:$4 sm:$0xff]  }
 0x1da   :  { %2869 = vmatprep.subr.bf16.mxu1 %v4391_v51  ;;  %2910 = vmatprep.subr.bf16.mxu0 %v4394_v44  ;;  %v4472_v50 = vld [vmem:[#allocation5 + $0x6e4] ss:$16 sps:$4 sm:$0xff]   ;;  %v5165_v51 = vsub.s32 0, %v5138_v27  ;;  %v5168_v44 = vsub.s32 2, %v5138_v27 }
 0x1dd   :  { %2870 = vmatpush1.bf16.msra.mxu1 %v4389_v1  ;;  %2911 = vmatpush1.bf16.msra.mxu0 %v4392_v52  ;;  %v5171_v1 = vsub.s32 1, %v5138_v27  ;;  %v5174_v52 = vsub.s32 3, %v5138_v27 }
 0x1de   :  { %2871 = vmatprep.subr.bf16.mxu1 %v4397_v53  ;;  %2912 = vmatprep.subr.bf16.mxu0 %v4400_v54  ;;  %v967_v53 = vrot.slane %v5145_v32, %v5165_v51  ;;  %v975_v54 = vrot.slane %v5145_v32, %v5168_v44 }
 0x1e1   :  { %2872 = vmatpush1.bf16.msra.mxu1 %v4395_v14  ;;  %2913 = vmatpush1.bf16.msra.mxu0 %v4398_v16  ;;  %v5182_v14 = vrot.slane %v5145_v32, %v5171_v1  ;;  %v5186_v16 = vrot.slane %v5145_v32, %v5174_v52 }
 0x1e2   :  { %2873 = vmatprep.subr.bf16.mxu1 %v4403_v20  ;;  %2914 = vmatprep.subr.bf16.mxu0 %v4406_v55  ;;  %v5190_v55 = vrot.slane %v5156_v37, %v5165_v51 }
 0x1e5   :  { %2874 = vmatpush1.bf16.msra.mxu1 %v4401_v56  ;;  %2915 = vmatpush1.bf16.msra.mxu0 %v4404_v57  ;;  %v5194_v57 = vrot.slane %v5156_v37, %v5168_v44 }
 0x1e6   :  { %2875 = vmatprep.subr.bf16.mxu1 %v4409_v58  ;;  %2916 = vmatprep.subr.bf16.mxu0 %v4412_v59 }
 0x1e9   :  { %2876 = vmatpush1.bf16.msra.mxu1 %v4407_v60  ;;  %2917 = vmatpush1.bf16.msra.mxu0 %v4410_v61  ;;  %v5198_v61 = vrot.slane %v5156_v37, %v5171_v1 }
 0x1ea   :  { %2877 = vmatprep.subr.bf16.mxu1 %v4415_v62  ;;  %2918 = vmatprep.subr.bf16.mxu0 %v4418_v63  ;;  %v5202_v63 = vrot.slane %v5156_v37, %v5174_v52 }
 0x1ed   :  { %2878 = vmatpush1.bf16.msra.mxu1 %v4413_v0  ;;  %2919 = vmatpush1.bf16.msra.mxu0 %v4416_v2 }
 0x1ee   :  { %2879 = vmatprep.subr.bf16.mxu1 %v4421_v3  ;;  %2920 = vmatprep.subr.bf16.mxu0 %v4424_v4 }
 0x1f1   :  { %2880 = vmatpush2.bf16.msra.mxu1 %v4419_v5  ;;  %2921 = vmatpush2.bf16.msra.mxu0 %v4422_v6 }
 0x1f2   :  { %2881 = vmatprep.subr.bf16.mxu1 %v4427_v7  ;;  %2922 = vmatprep.subr.bf16.mxu0 %v4430_v8 }
 0x1f5   :  { %2882 = vmatpush2.bf16.msra.mxu1 %v4425_v9  ;;  %2923 = vmatpush2.bf16.msra.mxu0 %v4428_v10 }
 0x1f6   :  { %2883 = vmatprep.subr.bf16.mxu1 %v4433_v11  ;;  %2924 = vmatprep.subr.bf16.mxu0 %v4436_v12 }
 0x1f9   :  { %2884 = vmatpush2.bf16.msra.mxu1 %v4431_v13  ;;  %2925 = vmatpush2.bf16.msra.mxu0 %v4434_v15 }
 0x1fa   :  { %2885 = vmatprep.subr.bf16.mxu1 %v4439_v17  ;;  %2926 = vmatprep.subr.bf16.mxu0 %v4442_v18 }
 0x1fd   :  { %2886 = vmatpush2.bf16.msra.mxu1 %v4437_v19  ;;  %2927 = vmatpush2.bf16.msra.mxu0 %v4440_v21 }
 0x1fe   :  { %2887 = vmatprep.subr.bf16.mxu1 %v4445_v23  ;;  %2928 = vmatprep.subr.bf16.mxu0 %v4448_v24 }
 0x201   :  { %2888 = vmatpush2.bf16.msra.mxu1 %v4443_v25  ;;  %2929 = vmatpush2.bf16.msra.mxu0 %v4446_v26 }
 0x202   :  { %2889 = vmatprep.subr.bf16.mxu1 %v4451_v28  ;;  %2930 = vmatprep.subr.bf16.mxu0 %v4454_v29 }
 0x205   :  { %2890 = vmatpush2.bf16.msra.mxu1 %v4449_v33  ;;  %2931 = vmatpush2.bf16.msra.mxu0 %v4452_v34 }
 0x206   :  { %2891 = vmatprep.subr.bf16.mxu1 %v4457_v40  ;;  %2932 = vmatprep.subr.bf16.mxu0 %v4460_v41 }
 0x209   :  { %2892 = vmatpush2.bf16.msra.mxu1 %v4455_v42  ;;  %2933 = vmatpush2.bf16.msra.mxu0 %v4458_v43 }
 0x20a   :  { %2893 = vmatprep.subr.bf16.mxu1 %v4463_v45  ;;  %2934 = vmatprep.subr.bf16.mxu0 %v4466_v46 }
 0x20d   :  { %2894 = vmatpush2.bf16.msra.mxu1 %v4461_v47  ;;  %2935 = vmatpush2.bf16.msra.mxu0 %v4464_v48 }
 0x20e   :  { %2945 = vmatprep.subr.bf16.mxu1 %v4469_v49  ;;  %2986 = vmatprep.subr.bf16.mxu0 %v4472_v50 }
 0x26f   :  { %v784_v20 = vpop.f32.mrf.mxu1  ;;  %v837_v56 = vpop.f32.mrf.mxu0 }
 0x270   :  { %v1004_v58 = vmul.f32 %v967_v53, %v784_v20  ;;  %v1006_v59 = vmul.f32 %v975_v54, %v837_v56 }
 0x271   :  { %v786_v60 = vpop.f32.mrf.mxu1  ;;  %v839_v62 = vpop.f32.mrf.mxu0 }
 0x272   :  { %v1005_v0 = vmul.f32 %v5182_v14, %v786_v60  ;;  %v1007_v2 = vmul.f32 %v5186_v16, %v839_v62  ;;  %v1078_v3 = vadd.f32 %v5190_v55, %v1004_v58  ;;  %v1080_v4 = vadd.f32 %v5194_v57, %v1006_v59 }
 0x273   :  { %v788_v5 = vpop.f32.mrf.mxu1  ;;  %v841_v6 = vpop.f32.mrf.mxu0 }
 0x274   :  { %v1079_v7 = vadd.f32 %v5198_v61, %v1005_v0  ;;  %v1081_v8 = vadd.f32 %v5202_v63, %v1007_v2  ;;  %v1012_v9 = vmul.f32 %v967_v53, %v788_v5  ;;  %v1014_v10 = vmul.f32 %v975_v54, %v841_v6 }
 0x275   :  { %v790_v11 = vpop.f32.mrf.mxu1  ;;  %v843_v12 = vpop.f32.mrf.mxu0  ;;  %v1110_v17 = vmax.f32 %v1078_v3, 0.0  ;;  %v1112_v18 = vmax.f32 %v1080_v4, 0.0 }
 0x276   :  { %v1013_v13 = vmul.f32 %v5182_v14, %v790_v11  ;;  %v1015_v15 = vmul.f32 %v5186_v16, %v843_v12  ;;  %v1086_v19 = vadd.f32 %v5190_v55, %v1012_v9  ;;  %v1088_v21 = vadd.f32 %v5194_v57, %v1014_v10 }
 0x277   :  { %v794_v23 = vpop.f32.mrf.mxu1  ;;  %v847_v24 = vpop.f32.mrf.mxu0  ;;  %v1111_v30 = vmax.f32 %v1079_v7, 0.0  ;;  %v1113_v31 = vmax.f32 %v1081_v8, 0.0 }
 0x278   :  { %v1087_v25 = vadd.f32 %v5198_v61, %v1013_v13  ;;  %v1089_v26 = vadd.f32 %v5202_v63, %v1015_v15  ;;  %v1020_v28 = vmul.f32 %v967_v53, %v794_v23  ;;  %v1022_v29 = vmul.f32 %v975_v54, %v847_v24 }
 0x279   :  { %v1118_v33 = vmax.f32 %v1086_v19, 0.0  ;;  %v1120_v34 = vmax.f32 %v1088_v21, 0.0  ;;  %v796_v40 = vpop.f32.mrf.mxu1  ;;  %v849_v41 = vpop.f32.mrf.mxu0 }
 0x27a   :  { %v1119_v42 = vmax.f32 %v1087_v25, 0.0  ;;  %v1121_v43 = vmax.f32 %v1089_v26, 0.0  ;;  %v1094_v45 = vadd.f32 %v5190_v55, %v1020_v28  ;;  %v1096_v46 = vadd.f32 %v5194_v57, %v1022_v29 }
 0x27b   :  { %v1142_v47 = vmax.f32 %v1110_v17, %v1118_v33  ;;  %v1156_v48 = vmax.f32 %v1112_v18, %v1120_v34  ;;  %v1021_v49 = vmul.f32 %v5182_v14, %v796_v40  ;;  %v1023_v50 = vmul.f32 %v5186_v16, %v849_v41  ;;  %v798_v20 = vpop.f32.mrf.mxu1  ;;  %v851_v56 = vpop.f32.mrf.mxu0 }
 0x27c   :  { %v1149_v58 = vmax.f32 %v1111_v30, %v1119_v42  ;;  %v1163_v59 = vmax.f32 %v1113_v31, %v1121_v43  ;;  %v1028_v3 = vmul.f32 %v967_v53, %v798_v20  ;;  %v1030_v4 = vmul.f32 %v975_v54, %v851_v56 }
 0x27d   :  { %v1143_v60 = vrot.slane %v1142_v47, 4  ;;  %v1157_v62 = vrot.slane %v1156_v48, 4  ;;  %v800_v5 = vpop.f32.mrf.mxu1  ;;  %v853_v6 = vpop.f32.mrf.mxu0  ;;  %v1126_v7 = vmax.f32 %v1094_v45, 0.0  ;;  %v1128_v8 = vmax.f32 %v1096_v46, 0.0 }
 0x27e   :  { %v1150_v0 = vrot.slane %v1149_v58, 4  ;;  %v1164_v2 = vrot.slane %v1163_v59, 4  ;;  %v1095_v9 = vadd.f32 %v5198_v61, %v1021_v49  ;;  %v1097_v10 = vadd.f32 %v5202_v63, %v1023_v50 }
 0x27f   :  { %v1102_v13 = vadd.f32 %v5190_v55, %v1028_v3  ;;  %v1104_v15 = vadd.f32 %v5194_v57, %v1030_v4  ;;  %v1144_v17 = vmax.f32 %v1142_v47, %v1143_v60  ;;  %v1158_v18 = vmax.f32 %v1156_v48, %v1157_v62 }
 0x280   :  { %v1151_v11 = vmax.f32 %v1149_v58, %v1150_v0  ;;  %v1165_v12 = vmax.f32 %v1163_v59, %v1164_v2  ;;  %v1029_v19 = vmul.f32 %v5182_v14, %v800_v5  ;;  %v1031_v53 = vmul.f32 %v5186_v16, %v853_v6 }
 0x281   :  { %v1134_v23 = vmax.f32 %v1102_v13, 0.0  ;;  %v1136_v24 = vmax.f32 %v1104_v15, 0.0  ;;  %v1127_v28 = vmax.f32 %v1095_v9, 0.0  ;;  %v1129_v29 = vmax.f32 %v1097_v10, 0.0 }
 0x282   :  { %v1152_v54 = vrot.slane %v1151_v11, 2  ;;  %v1166_v21 = vrot.slane %v1165_v12, 2  ;;  %v1103_v25 = vadd.f32 %v5198_v61, %v1029_v19  ;;  %v1105_v26 = vadd.f32 %v5202_v63, %v1031_v53 }
 0x283   :  { %v1198_v30 = vmax.f32 %v1126_v7, %v1134_v23  ;;  %v1212_v55 = vmax.f32 %v1128_v8, %v1136_v24  ;;  %v1145_v31 = vrot.slane %v1144_v17, 2  ;;  %v1159_v57 = vrot.slane %v1158_v18, 2 }
 0x284   :  { %v1135_v33 = vmax.f32 %v1103_v25, 0.0  ;;  %v1137_v34 = vmax.f32 %v1105_v26, 0.0  ;;  %v1153_v40 = vmax.f32 %v1151_v11, %v1152_v54  ;;  %v1167_v14 = vmax.f32 %v1165_v12, %v1166_v21 }
 0x285   :  { %v1199_v41 = vrot.slane %v1198_v30, 4  ;;  %v1213_v16 = vrot.slane %v1212_v55, 4  ;;  %v986_v61 = vsub.s32 5, %v5138_v27  ;;  %v994_v63 = vsub.s32 7, %v5138_v27 }
 0x286   :  { %v1205_v42 = vmax.f32 %v1127_v28, %v1135_v33  ;;  %v1219_v43 = vmax.f32 %v1129_v29, %v1137_v34  ;;  %v1146_v47 = vmax.f32 %v1144_v17, %v1145_v31  ;;  %v1160_v48 = vmax.f32 %v1158_v18, %v1159_v57 }
 0x287   :  { %v1200_v45 = vmax.f32 %v1198_v30, %v1199_v41  ;;  %v1214_v46 = vmax.f32 %v1212_v55, %v1213_v16  ;;  %v1154_v20 = vrot.slane %v1153_v40, 1  ;;  %v1168_v56 = vrot.slane %v1167_v14, 1 }
 0x288   :  { %v1206_v49 = vrot.slane %v1205_v42, 4  ;;  %v1220_v50 = vrot.slane %v1219_v43, 4  ;;  %v5231_v3 = vrot.slane %v5145_v32, %v986_v61  ;;  %v5234_v4 = vrot.slane %v5145_v32, %v994_v63 }
 0x289   :  { %v1201_v58 = vrot.slane %v1200_v45, 2  ;;  %v1215_v59 = vrot.slane %v1214_v46, 2  ;;  %v1147_v5 = vrot.slane %v1146_v47, 1  ;;  %v1161_v27 = vrot.slane %v1160_v48, 1 }
 0x28a   :  { %v1207_v60 = vmax.f32 %v1205_v42, %v1206_v49  ;;  %v1221_v62 = vmax.f32 %v1219_v43, %v1220_v50  ;;  %v5236_v10 = vmax.f32 %v1153_v40, %v1154_v20  ;;  %v5238_v11 = vmax.f32 %v1167_v14, %v1168_v56 }
 0x28b   :  { %v1202_v0 = vmax.f32 %v1200_v45, %v1201_v58  ;;  %v1216_v2 = vmax.f32 %v1214_v46, %v1215_v59  ;;  %v5241_v18 = vrot.slane %v5156_v37, %v986_v61  ;;  %v5244_v32 = vrot.slane %v5156_v37, %v994_v63 }
 0x28c   :  { %v1208_v6 = vrot.slane %v1207_v60, 2  ;;  %v1222_v7 = vrot.slane %v1221_v62, 2  ;;  %v5250_v23 = vmax.f32 %v1146_v47, %v1147_v5  ;;  %v5252_v24 = vmax.f32 %v1160_v48, %v1161_v27 }
 0x28d   :  { %v1203_v8 = vrot.slane %v1202_v0, 1  ;;  %v1217_v9 = vrot.slane %v1216_v2, 1  ;;  %v1255_v55 = vpack.c.bf16 %v5236_v10, %v5236_v10  ;;  %v1257_v31 = vpack.c.bf16 %v5238_v11, %v5238_v11 }
 0x28e   :  { %v1209_v12 = vmax.f32 %v1207_v60, %v1208_v6  ;;  %v1223_v13 = vmax.f32 %v1221_v62, %v1222_v7 }
 0x28f   :  { %v890_v15 = vpop.f32.mrf.mxu1  ;;  %v943_v17 = vpop.f32.mrf.mxu0  ;;  %v1204_v19 = vmax.f32 %v1202_v0, %v1203_v8  ;;  %v5246_v53 = vmax.f32 %v1216_v2, %v1217_v9 }
 0x290   :  { %v1008_v54 = vmul.f32 %v5148_v35, %v890_v15  ;;  %v1010_v21 = vmul.f32 %v5151_v36, %v943_v17  ;;  %v1210_v25 = vrot.slane %v1209_v12, 1  ;;  %v1224_v26 = vrot.slane %v1223_v13, 1 }
 0x291   :  { %v892_v28 = vpop.f32.mrf.mxu1  ;;  %v945_v29 = vpop.f32.mrf.mxu0  ;;  %v1262_v16 = vpack.c.bf16 %v1204_v19, %v1204_v19  ;;  %v1264_v42 = vpack.c.bf16 %v5246_v53, %v5246_v53 }
 0x292   :  { %v1082_v30 = vadd.f32 %v5159_v38, %v1008_v54  ;;  %v1084_v37 = vadd.f32 %v5162_v39, %v1010_v21  ;;  %v1009_v57 = vmul.f32 %v5231_v3, %v892_v28  ;;  %v1011_v33 = vmul.f32 %v5234_v4, %v945_v29 }
 0x293   :  { %v894_v34 = vpop.f32.mrf.mxu1  ;;  %v947_v40 = vpop.f32.mrf.mxu0  ;;  %v1211_v14 = vmax.f32 %v1209_v12, %v1210_v25  ;;  %v1225_v41 = vmax.f32 %v1223_v13, %v1224_v26  ;;  %v1254_v21 = vpack.c.bf16 %v5250_v23, %v5250_v23  ;;  %v1256_v25 = vpack.c.bf16 %v5252_v24, %v5252_v24 }
 0x294   :  { %v1114_v43 = vmax.f32 %v1082_v30, 0.0  ;;  %v1116_v45 = vmax.f32 %v1084_v37, 0.0  ;;  %v1083_v46 = vadd.f32 %v5241_v18, %v1009_v57  ;;  %v1085_v61 = vadd.f32 %v5244_v32, %v1011_v33 }
 0x295   :  { %v1016_v63 = vmul.f32 %v5148_v35, %v894_v34  ;;  %v1018_v47 = vmul.f32 %v5151_v36, %v947_v40  ;;  %v896_v48 = vpop.f32.mrf.mxu1  ;;  %v949_v49 = vpop.f32.mrf.mxu0  ;;  %v1263_v56 = vpack.c.bf16 %v1211_v14, %v1211_v14  ;;  %v1265_v58 = vpack.c.bf16 %v1225_v41, %v1225_v41 }
 0x296   :  { %v1017_v50 = vmul.f32 %v5231_v3, %v896_v48  ;;  %v1019_v20 = vmul.f32 %v5234_v4, %v949_v49  ;;  %v1115_v59 = vmax.f32 %v1083_v46, 0.0  ;;  %v1117_v60 = vmax.f32 %v1085_v61, 0.0 }
 0x297   :  { %v1090_v62 = vadd.f32 %v5159_v38, %v1016_v63  ;;  %v1092_v0 = vadd.f32 %v5162_v39, %v1018_v47  ;;  %v900_v2 = vpop.f32.mrf.mxu1  ;;  %v953_v5 = vpop.f32.mrf.mxu0  ;;  %v1551_v11 = vunpack.c.l.b16 %v1263_v56  ;;  %v1553_v12 = vunpack.c.l.b16 %v1265_v58 }
 0x298   :  { %v1091_v27 = vadd.f32 %v5241_v18, %v1017_v50  ;;  %v1093_v6 = vadd.f32 %v5244_v32, %v1019_v20  ;;  %v1024_v7 = vmul.f32 %v5148_v35, %v900_v2  ;;  %v1026_v8 = vmul.f32 %v5151_v36, %v953_v5 }
 0x299   :  { %v1122_v9 = vmax.f32 %v1090_v62, 0.0  ;;  %v1124_v10 = vmax.f32 %v1092_v0, 0.0  ;;  %v902_v53 = vpop.f32.mrf.mxu1  ;;  %v955_v54 = vpop.f32.mrf.mxu0  ;;  %v1543_v37 = vunpack.c.l.b16 %v1255_v55  ;;  %v1545_v57 = vunpack.c.l.b16 %v1257_v31  ;;  %v4467_v62 = vld [vmem:[#allocation5 + $0x4e0] ss:$16 sps:$4 sm:$0xff]  }
 0x29a   :  { %v1123_v13 = vmax.f32 %v1091_v27, 0.0  ;;  %v1125_v15 = vmax.f32 %v1093_v6, 0.0  ;;  %v5277_v17 = vadd.f32 %v5159_v38, %v1024_v7  ;;  %v5280_v19 = vadd.f32 %v5162_v39, %v1026_v8  ;;  %v4470_v6 = vld [vmem:[#allocation5 + $0x6e0] ss:$16 sps:$4 sm:$0xff]  }
 0x29b   :  { %v1170_v26 = vmax.f32 %v1114_v43, %v1122_v9  ;;  %v1184_v28 = vmax.f32 %v1116_v45, %v1124_v10  ;;  %v1550_v33 = vunpack.c.l.b16 %v1262_v16  ;;  %v1552_v14 = vunpack.c.l.b16 %v1264_v42  ;;  %v904_v23 = vpop.f32.mrf.mxu1  ;;  %v957_v63 = vpop.f32.mrf.mxu0  ;;  %v4475_v9 = vld [vmem:[#allocation5 + $0x4c4] ss:$16 sps:$4 sm:$0xff]  }
 0x29c   :  { %v1177_v29 = vmax.f32 %v1115_v59, %v1123_v13  ;;  %v1191_v30 = vmax.f32 %v1117_v60, %v1125_v15  ;;  %v1560_v46 = vsel %vm1558_vm1, %v1551_v11, %v1543_v37  ;;  %v1562_v61 = vsel %vm1558_vm1, %v1553_v12, %v1545_v57  ;;  %v4476_v37 = vld [vmem:[#allocation5 + $0x6c0] ss:$16 sps:$4 sm:$0xff]   ;;  %v4481_v57 = vld [vmem:[#allocation5 + $0x4a4] ss:$16 sps:$4 sm:$0xff]  }
 0x29d   :  { %v1171_v34 = vrot.slane %v1170_v26, 4  ;;  %v1185_v40 = vrot.slane %v1184_v28, 4  ;;  %v1542_v47 = vunpack.c.l.b16 %v1254_v21  ;;  %v1544_v45 = vunpack.c.l.b16 %v1256_v25  ;;  %v906_v5 = vpop.f32.mrf.mxu1 }
 0x29e   :  { %v1178_v41 = vrot.slane %v1177_v29, 4  ;;  %v1192_v48 = vrot.slane %v1191_v30, 4  ;;  %v5288_v49 = vpack.c.b16 %v1560_v46, %v1560_v46  ;;  %v5290_v55 = vpack.c.b16 %v1562_v61, %v1562_v61 }
 0x29f   :  { %v1172_v24 = vmax.f32 %v1170_v26, %v1171_v34  ;;  %v1186_v43 = vmax.f32 %v1184_v28, %v1185_v40  ;;  %v1025_v31 = vmul.f32 %v5231_v3, %v902_v53  ;;  %v1027_v16 = vmul.f32 %v5234_v4, %v955_v54  ;;  %v4473_v26 = vld [vmem:[#allocation5 + $0x4c0] ss:$16 sps:$4 sm:$0xff]  }
 0x2a0   :  { %v1032_v42 = vmul.f32 %v5148_v35, %v904_v23  ;;  %v1034_v50 = vmul.f32 %v5151_v36, %v957_v63  ;;  %v1179_v20 = vmax.f32 %v1177_v29, %v1178_v41  ;;  %2895 = vmatprep.mubr.bf16.mxu1 %v5288_v49  ;;  %2936 = vmatprep.mubr.bf16.mxu0 %v5290_v55  ;;  %v959_v35 = vpop.f32.mrf.mxu0  ;;  %v1130_v36 = vmax.f32 %v5277_v17, 0.0 }
 0x2a1   :  { %v1559_v56 = vsel %vm1558_vm1, %v1550_v33, %v1542_v47  ;;  %v1561_v58 = vsel %vm1558_vm1, %v1552_v14, %v1544_v45  ;;  %v1173_v59 = vrot.slane %v1172_v24, 2  ;;  %v1187_v60 = vrot.slane %v1186_v43, 2  ;;  %v4482_v45 = vld [vmem:[#allocation5 + $0x6a0] ss:$16 sps:$4 sm:$0xff]  }
 0x2a2   :  { %v1106_v0 = vadd.f32 %v5159_v38, %v1032_v42  ;;  %v1108_v2 = vadd.f32 %v5162_v39, %v1034_v50  ;;  %v1193_v27 = vmax.f32 %v1191_v30, %v1192_v48  ;;  %v5303_v7 = vpack.c.b16 %v1559_v56, %v1559_v56  ;;  %v4478_v38 = vld [vmem:[#allocation5 + $0x6c4] ss:$16 sps:$4 sm:$0xff]  }
 0x2a3   :  { %v5305_v8 = vpack.c.b16 %v1561_v58, %v1561_v58  ;;  %v1132_v10 = vmax.f32 %v5280_v19, 0.0  ;;  %v1099_v11 = vadd.f32 %v5241_v18, %v1025_v31  ;;  %v1180_v15 = vrot.slane %v1179_v20, 2  ;;  %v4487_v48 = vld [vmem:[#allocation5 + $0x484] ss:$16 sps:$4 sm:$0xff]  }
 0x2a4   :  { %v1138_v12 = vmax.f32 %v1106_v0, 0.0  ;;  %v1140_v13 = vmax.f32 %v1108_v2, 0.0  ;;  %v1101_v39 = vadd.f32 %v5244_v32, %v1027_v16  ;;  %2896 = vmatmul.mubr.bf16.vlgmr.msra.gmra.mxu1 %v5303_v7  ;;  %v1033_v17 = vmul.f32 %v5231_v3, %v906_v5  ;;  %v4490_v42 = vld [vmem:[#allocation5 + $0x684] ss:$16 sps:$4 sm:$0xff]   ;;  %v4485_v0 = vld [vmem:[#allocation5 + $0x480] ss:$16 sps:$4 sm:$0xff]  }
 0x2a5   :  { %2937 = vmatmul.mubr.bf16.vlgmr.msra.gmra.mxu0 %v5305_v8  ;;  %v1035_v53 = vmul.f32 %v5234_v4, %v959_v35  ;;  %v1174_v54 = vmax.f32 %v1172_v24, %v1173_v59  ;;  %v1188_v21 = vmax.f32 %v1186_v43, %v1187_v60  ;;  %2946 = vmatpush1.bf16.msra.mxu1 %v4467_v62  ;;  %v1194_v28 = vrot.slane %v1193_v27, 2  ;;  %v4484_v4 = vld [vmem:[#allocation5 + $0x6a4] ss:$16 sps:$4 sm:$0xff]  }
 0x2a6   :  { %v1226_v25 = vmax.f32 %v1130_v36, %v1138_v12  ;;  %v1240_v19 = vmax.f32 %v1132_v10, %v1140_v13  ;;  %2987 = vmatpush1.bf16.msra.mxu0 %v4470_v6  ;;  %v1107_v29 = vadd.f32 %v5241_v18, %v1033_v17  ;;  %2947 = vmatprep.subr.bf16.mxu1 %v4475_v9  ;;  %v1131_v33 = vmax.f32 %v1099_v11, 0.0  ;;  %v4479_v18 = vld [vmem:[#allocation5 + $0x4a0] ss:$16 sps:$4 sm:$0xff]   ;;  %v4493_v36 = vld [vmem:[#allocation5 + $0x464] ss:$16 sps:$4 sm:$0xff]  }
 0x2a7   :  { %v1109_v30 = vadd.f32 %v5244_v32, %v1035_v53  ;;  %2988 = vmatprep.subr.bf16.mxu0 %v4478_v38  ;;  %v1181_v40 = vmax.f32 %v1179_v20, %v1180_v15  ;;  %v1133_v14 = vmax.f32 %v1101_v39, 0.0  ;;  %v1175_v61 = vrot.slane %v1174_v54, 1  ;;  %v4496_v10 = vld [vmem:[#allocation5 + $0x664] ss:$16 sps:$4 sm:$0xff]   ;;  %v4491_v53 = vld [vmem:[#allocation5 + $0x460] ss:$16 sps:$4 sm:$0xff]  }
 0x2a8   :  { %v1227_v34 = vrot.slane %v1226_v25, 4  ;;  %v1241_v3 = vrot.slane %v1240_v19, 4  ;;  %v1139_v41 = vmax.f32 %v1107_v29, 0.0  ;;  %v1189_v23 = vrot.slane %v1188_v21, 1 }
 0x2a9   :  { %v1141_v46 = vmax.f32 %v1109_v30, 0.0  ;;  %2948 = vmatpush1.bf16.msra.mxu1 %v4473_v26  ;;  %v1195_v24 = vmax.f32 %v1193_v27, %v1194_v28  ;;  %v1182_v50 = vrot.slane %v1181_v40, 1  ;;  %v1176_v58 = vmax.f32 %v1174_v54, %v1175_v61  ;;  %v4488_v27 = vld [vmem:[#allocation5 + $0x680] ss:$16 sps:$4 sm:$0xff]   ;;  %v4502_v30 = vld [vmem:[#allocation5 + $0x644] ss:$16 sps:$4 sm:$0xff]  }
 0x2aa   :  { %v1228_v63 = vmax.f32 %v1226_v25, %v1227_v34  ;;  %v1242_v47 = vmax.f32 %v1240_v19, %v1241_v3  ;;  %v1233_v32 = vmax.f32 %v1131_v33, %v1139_v41  ;;  %2989 = vmatpush1.bf16.msra.mxu0 %v4476_v37  ;;  %2949 = vmatprep.subr.bf16.mxu1 %v4481_v57  ;;  %v4494_v25 = vld [vmem:[#allocation5 + $0x660] ss:$16 sps:$4 sm:$0xff]   ;;  %v4499_v19 = vld [vmem:[#allocation5 + $0x444] ss:$16 sps:$4 sm:$0xff]  }
 0x2ab   :  { %v1247_v43 = vmax.f32 %v1133_v14, %v1141_v46  ;;  %2990 = vmatprep.subr.bf16.mxu0 %v4484_v4  ;;  %v1190_v59 = vmax.f32 %v1188_v21, %v1189_v23  ;;  %v1196_v2 = vrot.slane %v1195_v24, 1  ;;  %v1183_v13 = vmax.f32 %v1181_v40, %v1182_v50  ;;  %v4497_v14 = vld [vmem:[#allocation5 + $0x440] ss:$16 sps:$4 sm:$0xff]   ;;  %v4505_v46 = vld [vmem:[#allocation5 + $0x424] ss:$16 sps:$4 sm:$0xff]  }
 0x2ac   :  { %v1229_v31 = vrot.slane %v1228_v63, 2  ;;  %v1243_v16 = vrot.slane %v1242_v47, 2  ;;  %v1234_v20 = vrot.slane %v1233_v32, 4  ;;  %v1258_v38 = vpack.c.bf16 %v1176_v58, %v1176_v58  ;;  %v4500_v41 = vld [vmem:[#allocation5 + $0x640] ss:$16 sps:$4 sm:$0xff]  }
 0x2ad   :  { %v1248_v56 = vrot.slane %v1247_v43, 4  ;;  %2950 = vmatpush1.bf16.msra.mxu1 %v4479_v18  ;;  %v1260_v15 = vpack.c.bf16 %v1190_v59, %v1190_v59  ;;  %v1197_v26 = vmax.f32 %v1195_v24, %v1196_v2  ;;  %v1259_v33 = vpack.c.bf16 %v1183_v13, %v1183_v13  ;;  %v4512_v2 = vld [vmem:[#allocation5 + $0x600] ss:$16 sps:$4 sm:$0xff]   ;;  %v4532_v13 = vld [vmem:[#allocation5 + $0x7a4] ss:$16 sps:$4 sm:$0xff]  }
 0x2ae   :  { %v1230_v60 = vmax.f32 %v1228_v63, %v1229_v31  ;;  %v1244_v62 = vmax.f32 %v1242_v47, %v1243_v16  ;;  %v1235_v5 = vmax.f32 %v1233_v32, %v1234_v20  ;;  %2991 = vmatpush1.bf16.msra.mxu0 %v4482_v45  ;;  %2951 = vmatprep.subr.bf16.mxu1 %v4487_v48  ;;  %v1546_v34 = vunpack.c.l.b16 %v1258_v38  ;;  %v4508_v47 = vld [vmem:[#allocation5 + $0x624] ss:$16 sps:$4 sm:$0xff]   ;;  %v4503_v45 = vld [vmem:[#allocation5 + $0x420] ss:$16 sps:$4 sm:$0xff]  }
 0x2af   :  { %v1249_v35 = vmax.f32 %v1247_v43, %v1248_v56  ;;  %2992 = vmatprep.subr.bf16.mxu0 %v4490_v42  ;;  %v1548_v3 = vunpack.c.l.b16 %v1260_v15  ;;  %v1261_v63 = vpack.c.bf16 %v1197_v26, %v1197_v26  ;;  %v4506_v48 = vld [vmem:[#allocation5 + $0x620] ss:$16 sps:$4 sm:$0xff]   ;;  %v4511_v31 = vld [vmem:[#allocation5 + $0x404] ss:$16 sps:$4 sm:$0xff]   ;;  %v1547_v16 = vunpack.c.l.b16 %v1259_v33 }
 0x2b0   :  { %v1231_v6 = vrot.slane %v1230_v60, 1  ;;  %v1245_v9 = vrot.slane %v1244_v62, 1  ;;  %v1236_v11 = vrot.slane %v1235_v5, 2  ;;  %v4514_v56 = vld [vmem:[#allocation5 + $0x604] ss:$16 sps:$4 sm:$0xff]  }
 0x2b1   :  { %v1250_v12 = vrot.slane %v1249_v35, 2  ;;  %2952 = vmatpush1.bf16.msra.mxu1 %v4485_v0  ;;  %v1549_v50 = vunpack.c.l.b16 %v1261_v63  ;;  %v4527_v38 = vld [vmem:[#allocation5 + $0x5a0] ss:$16 sps:$4 sm:$0xff]   ;;  %v4556_v33 = vld [vmem:[#allocation5 + $0x724] ss:$16 sps:$4 sm:$0xff]  }
 0x2b2   :  { %v1232_v39 = vmax.f32 %v1230_v60, %v1231_v6  ;;  %v1246_v17 = vmax.f32 %v1244_v62, %v1245_v9  ;;  %v1237_v54 = vmax.f32 %v1235_v5, %v1236_v11  ;;  %2993 = vmatpush1.bf16.msra.mxu0 %v4488_v27  ;;  %2953 = vmatprep.subr.bf16.mxu1 %v4493_v36  ;;  %v4509_v60 = vld [vmem:[#allocation5 + $0x400] ss:$16 sps:$4 sm:$0xff]   ;;  %v4517_v5 = vld [vmem:[#allocation5 + $0x5e4] ss:$16 sps:$4 sm:$0xff]  }
 0x2b3   :  { %v1251_v21 = vmax.f32 %v1249_v35, %v1250_v12  ;;  %2994 = vmatprep.subr.bf16.mxu0 %v4496_v10  ;;  %v4520_v35 = vld [vmem:[#allocation5 + $0x7e4] ss:$16 sps:$4 sm:$0xff]   ;;  %v4515_v27 = vld [vmem:[#allocation5 + $0x5e0] ss:$16 sps:$4 sm:$0xff]  }
 0x2b4   :  { %v1266_v28 = vpack.c.bf16 %v1232_v39, %v1232_v39  ;;  %v1268_v29 = vpack.c.bf16 %v1246_v17, %v1246_v17  ;;  %v1238_v37 = vrot.slane %v1237_v54, 1  ;;  %v4518_v36 = vld [vmem:[#allocation5 + $0x7e0] ss:$16 sps:$4 sm:$0xff]   ;;  %v4523_v6 = vld [vmem:[#allocation5 + $0x5c4] ss:$16 sps:$4 sm:$0xff]  }
 0x2b5   :  { %v1252_v57 = vrot.slane %v1251_v21, 1  ;;  %2954 = vmatpush1.bf16.msra.mxu1 %v4491_v53  ;;  %v4526_v9 = vld [vmem:[#allocation5 + $0x7c4] ss:$16 sps:$4 sm:$0xff]   ;;  %v4521_v10 = vld [vmem:[#allocation5 + $0x5c0] ss:$16 sps:$4 sm:$0xff]  }
 0x2b6   :  { %v1554_v4 = vunpack.c.l.b16 %v1266_v28  ;;  %v1556_v40 = vunpack.c.l.b16 %v1268_v29  ;;  %2995 = vmatpush1.bf16.msra.mxu0 %v4494_v25  ;;  %2955 = vmatprep.subr.bf16.mxu1 %v4499_v19  ;;  %v1239_v61 = vmax.f32 %v1237_v54, %v1238_v37  ;;  %v4524_v11 = vld [vmem:[#allocation5 + $0x7c0] ss:$16 sps:$4 sm:$0xff]   ;;  %v4529_v12 = vld [vmem:[#allocation5 + $0x5a4] ss:$16 sps:$4 sm:$0xff]  }
 0x2b7   :  { %v1253_v23 = vmax.f32 %v1251_v21, %v1252_v57  ;;  %2996 = vmatprep.subr.bf16.mxu0 %v4502_v30  ;;  %v4530_v15 = vld [vmem:[#allocation5 + $0x7a0] ss:$16 sps:$4 sm:$0xff]   ;;  %v4535_v39 = vld [vmem:[#allocation5 + $0x584] ss:$16 sps:$4 sm:$0xff]  }
 0x2b8   :  { %v5317_v18 = vsel %vm1558_vm1, %v1554_v4, %v1546_v34  ;;  %v5320_v24 = vsel %vm1558_vm1, %v1556_v40, %v1548_v3  ;;  %v1267_v32 = vpack.c.bf16 %v1239_v61, %v1239_v61  ;;  %v4538_v17 = vld [vmem:[#allocation5 + $0x784] ss:$16 sps:$4 sm:$0xff]   ;;  %v4533_v53 = vld [vmem:[#allocation5 + $0x580] ss:$16 sps:$4 sm:$0xff]   ;;  %v4568_v61 = vld [vmem:[#allocation5 + $0x2ec] ss:$16 sps:$4 sm:$0xff]  }
 0x2b9   :  { %v1269_v43 = vpack.c.bf16 %v1253_v23, %v1253_v23  ;;  %2956 = vmatpush1.bf16.msra.mxu1 %v4497_v14  ;;  %v4536_v54 = vld [vmem:[#allocation5 + $0x780] ss:$16 sps:$4 sm:$0xff]   ;;  %v4541_v21 = vld [vmem:[#allocation5 + $0x564] ss:$16 sps:$4 sm:$0xff]   ;;  %v4563_v23 = vld [vmem:[#allocation5 + $0xe8] ss:$16 sps:$4 sm:$0xff]   ;;  %v5332_v63 = vpack.c.b16 %v5317_v18, %v5317_v18 }
 0x2ba   :  { %2997 = vmatpush1.bf16.msra.mxu0 %v4500_v41  ;;  %2957 = vmatprep.subr.bf16.mxu1 %v4505_v46  ;;  %v1555_v42 = vunpack.c.l.b16 %v1267_v32  ;;  %v4544_v25 = vld [vmem:[#allocation5 + $0x764] ss:$16 sps:$4 sm:$0xff]   ;;  %v4539_v19 = vld [vmem:[#allocation5 + $0x560] ss:$16 sps:$4 sm:$0xff]   ;;  %v4565_v46 = vld [vmem:[#allocation5 + $0xec] ss:$16 sps:$4 sm:$0xff]   ;;  %v5336_v32 = vpack.c.b16 %v5320_v24, %v5320_v24 }
 0x2bb   :  { %v1557_v20 = vunpack.c.l.b16 %v1269_v43  ;;  %2998 = vmatprep.subr.bf16.mxu0 %v4508_v47  ;;  %v4542_v26 = vld [vmem:[#allocation5 + $0x760] ss:$16 sps:$4 sm:$0xff]   ;;  %v4547_v28 = vld [vmem:[#allocation5 + $0x544] ss:$16 sps:$4 sm:$0xff]   ;;  %v4566_v47 = vld [vmem:[#allocation5 + $0x2e8] ss:$16 sps:$4 sm:$0xff]  }
 0x2bc   :  { %v1564_v58 = vsel %vm1558_vm1, %v1555_v42, %v1547_v16  ;;  %v4550_v29 = vld [vmem:[#allocation5 + $0x744] ss:$16 sps:$4 sm:$0xff]   ;;  %v4545_v30 = vld [vmem:[#allocation5 + $0x540] ss:$16 sps:$4 sm:$0xff]   ;;  %v4571_v43 = vld [vmem:[#allocation5 + $0xcc] ss:$16 sps:$4 sm:$0xff]  }
 0x2bd   :  { %v1566_v59 = vsel %vm1558_vm1, %v1557_v20, %v1549_v50  ;;  %2958 = vmatpush1.bf16.msra.mxu1 %v4503_v45  ;;  %v5324_v62 = vpack.c.b16 %v1564_v58, %v1564_v58  ;;  %v4548_v37 = vld [vmem:[#allocation5 + $0x740] ss:$16 sps:$4 sm:$0xff]   ;;  %v4553_v57 = vld [vmem:[#allocation5 + $0x524] ss:$16 sps:$4 sm:$0xff]   ;;  %v4574_v45 = vld [vmem:[#allocation5 + $0x2cc] ss:$16 sps:$4 sm:$0xff]  }
 0x2be   :  { %v5326_v0 = vpack.c.b16 %v1566_v59, %v1566_v59  ;;  %2999 = vmatpush1.bf16.msra.mxu0 %v4506_v48  ;;  %2959 = vmatprep.subr.bf16.mxu1 %v4511_v31  ;;  %v4551_v34 = vld [vmem:[#allocation5 + $0x520] ss:$16 sps:$4 sm:$0xff]   ;;  %v4559_v4 = vld [vmem:[#allocation5 + $0x504] ss:$16 sps:$4 sm:$0xff]   ;;  %v4569_v48 = vld [vmem:[#allocation5 + $0xc8] ss:$16 sps:$4 sm:$0xff]  }
 0x2bf   :  { %3000 = vmatprep.subr.bf16.mxu0 %v4514_v56  ;;  %2977 = vmatprep.mubr.bf16.mxu1 %v5324_v62  ;;  %v4554_v3 = vld [vmem:[#allocation5 + $0x720] ss:$16 sps:$4 sm:$0xff]   ;;  %v4562_v40 = vld [vmem:[#allocation5 + $0x704] ss:$16 sps:$4 sm:$0xff]   ;;  %v4572_v18 = vld [vmem:[#allocation5 + $0x2c8] ss:$16 sps:$4 sm:$0xff]  }
 0x2c0   :  { %3018 = vmatprep.mubr.bf16.mxu0 %v5326_v0  ;;  %v4557_v14 = vld [vmem:[#allocation5 + $0x500] ss:$16 sps:$4 sm:$0xff]   ;;  %v4577_v31 = vld [vmem:[#allocation5 + $0xac] ss:$16 sps:$4 sm:$0xff]   ;;  %v4575_v24 = vld [vmem:[#allocation5 + $0xa8] ss:$16 sps:$4 sm:$0xff]  }
 0x2c1   :  { %2960 = vmatpush1.bf16.msra.mxu1 %v4509_v60  ;;  %v4560_v41 = vld [vmem:[#allocation5 + $0x700] ss:$16 sps:$4 sm:$0xff]   ;;  %v4580_v16 = vld [vmem:[#allocation5 + $0x2ac] ss:$16 sps:$4 sm:$0xff]   ;;  %v4578_v42 = vld [vmem:[#allocation5 + $0x2a8] ss:$16 sps:$4 sm:$0xff]  }
 0x2c2   :  { %3001 = vmatpush1.bf16.msra.mxu0 %v4512_v2  ;;  %2961 = vmatprep.subr.bf16.mxu1 %v4517_v5  ;;  %v4583_v50 = vld [vmem:[#allocation5 + $0x8c] ss:$16 sps:$4 sm:$0xff]   ;;  %v4581_v56 = vld [vmem:[#allocation5 + $0x88] ss:$16 sps:$4 sm:$0xff]  }
 0x2c3   :  { %3002 = vmatprep.subr.bf16.mxu0 %v4520_v35  ;;  %v4586_v20 = vld [vmem:[#allocation5 + $0x28c] ss:$16 sps:$4 sm:$0xff]   ;;  %v4590_v60 = vld [vmem:[#allocation5 + $0x268] ss:$16 sps:$4 sm:$0xff]  }
 0x2c4   :  { %v4589_v58 = vld [vmem:[#allocation5 + $0x6c] ss:$16 sps:$4 sm:$0xff]   ;;  %v4593_v35 = vld [vmem:[#allocation5 + $0x48] ss:$16 sps:$4 sm:$0xff]  }
 0x2c5   :  { %2962 = vmatpush2.bf16.msra.mxu1 %v4515_v27  ;;  %v4592_v59 = vld [vmem:[#allocation5 + $0x26c] ss:$16 sps:$4 sm:$0xff]   ;;  %v4596_v27 = vld [vmem:[#allocation5 + $0x248] ss:$16 sps:$4 sm:$0xff]  }
 0x2c6   :  { %3003 = vmatpush2.bf16.msra.mxu0 %v4518_v36  ;;  %2963 = vmatprep.subr.bf16.mxu1 %v4523_v6  ;;  %v4595_v2 = vld [vmem:[#allocation5 + $0x4c] ss:$16 sps:$4 sm:$0xff]  }
 0x2c7   :  { %3004 = vmatprep.subr.bf16.mxu0 %v4526_v9  ;;  %v4598_v5 = vld [vmem:[#allocation5 + $0x24c] ss:$16 sps:$4 sm:$0xff]   ;;  %v4599_v9 = vld [vmem:[#allocation5 + $0x28] ss:$16 sps:$4 sm:$0xff]  }
 0x2c8   :  { %v4601_v36 = vld [vmem:[#allocation5 + $0x2c] ss:$16 sps:$4 sm:$0xff]  }
 0x2c9   :  { %2964 = vmatpush2.bf16.msra.mxu1 %v4521_v10  ;;  %v4604_v6 = vld [vmem:[#allocation5 + $0x22c] ss:$16 sps:$4 sm:$0xff]   ;;  %v4602_v10 = vld [vmem:[#allocation5 + $0x228] ss:$16 sps:$4 sm:$0xff]  }
 0x2ca   :  { %3005 = vmatpush2.bf16.msra.mxu0 %v4524_v11  ;;  %2965 = vmatprep.subr.bf16.mxu1 %v4529_v12  ;;  %v4607_v11 = vld [vmem:[#allocation5 + $0xc] ss:$16 sps:$4 sm:$0xff]  }
 0x2cb   :  { %3006 = vmatprep.subr.bf16.mxu0 %v4532_v13  ;;  %v4610_v12 = vld [vmem:[#allocation5 + $0x20c] ss:$16 sps:$4 sm:$0xff]   ;;  %v4605_v13 = vld [vmem:[#allocation5 + $0x8] ss:$16 sps:$4 sm:$0xff]  }
 0x2cd   :  { %2966 = vmatpush2.bf16.msra.mxu1 %v4527_v38  ;;  %v4608_v38 = vld [vmem:[#allocation5 + $0x208] ss:$16 sps:$4 sm:$0xff]  }
 0x2ce   :  { %3007 = vmatpush2.bf16.msra.mxu0 %v4530_v15  ;;  %2967 = vmatprep.subr.bf16.mxu1 %v4535_v39  ;;  %v4613_v15 = vld [vmem:[#allocation5 + $0x1ec] ss:$16 sps:$4 sm:$0xff]  }
 0x2cf   :  { %3008 = vmatprep.subr.bf16.mxu0 %v4538_v17  ;;  %v4616_v39 = vld [vmem:[#allocation5 + $0x3ec] ss:$16 sps:$4 sm:$0xff]   ;;  %v4611_v17 = vld [vmem:[#allocation5 + $0x1e8] ss:$16 sps:$4 sm:$0xff]  }
 0x2d1   :  { %2968 = vmatpush2.bf16.msra.mxu1 %v4533_v53  ;;  %v4614_v53 = vld [vmem:[#allocation5 + $0x3e8] ss:$16 sps:$4 sm:$0xff]  }
 0x2d2   :  { %3009 = vmatpush2.bf16.msra.mxu0 %v4536_v54  ;;  %2969 = vmatprep.subr.bf16.mxu1 %v4541_v21  ;;  %v4619_v54 = vld [vmem:[#allocation5 + $0x1cc] ss:$16 sps:$4 sm:$0xff]  }
 0x2d3   :  { %3010 = vmatprep.subr.bf16.mxu0 %v4544_v25  ;;  %v4622_v21 = vld [vmem:[#allocation5 + $0x3cc] ss:$16 sps:$4 sm:$0xff]   ;;  %v4617_v25 = vld [vmem:[#allocation5 + $0x1c8] ss:$16 sps:$4 sm:$0xff]  }
 0x2d5   :  { %2970 = vmatpush2.bf16.msra.mxu1 %v4539_v19  ;;  %v4620_v19 = vld [vmem:[#allocation5 + $0x3c8] ss:$16 sps:$4 sm:$0xff]  }
 0x2d6   :  { %3011 = vmatpush2.bf16.msra.mxu0 %v4542_v26  ;;  %2971 = vmatprep.subr.bf16.mxu1 %v4547_v28  ;;  %v4625_v26 = vld [vmem:[#allocation5 + $0x1ac] ss:$16 sps:$4 sm:$0xff]  }
 0x2d7   :  { %3012 = vmatprep.subr.bf16.mxu0 %v4550_v29  ;;  %v4628_v28 = vld [vmem:[#allocation5 + $0x3ac] ss:$16 sps:$4 sm:$0xff]   ;;  %v4623_v29 = vld [vmem:[#allocation5 + $0x1a8] ss:$16 sps:$4 sm:$0xff]  }
 0x2d9   :  { %2972 = vmatpush2.bf16.msra.mxu1 %v4545_v30  ;;  %v4626_v30 = vld [vmem:[#allocation5 + $0x3a8] ss:$16 sps:$4 sm:$0xff]  }
 0x2da   :  { %3013 = vmatpush2.bf16.msra.mxu0 %v4548_v37  ;;  %2973 = vmatprep.subr.bf16.mxu1 %v4553_v57  ;;  %v4631_v37 = vld [vmem:[#allocation5 + $0x18c] ss:$16 sps:$4 sm:$0xff]  }
 0x2db   :  { %3014 = vmatprep.subr.bf16.mxu0 %v4556_v33  ;;  %v4634_v57 = vld [vmem:[#allocation5 + $0x38c] ss:$16 sps:$4 sm:$0xff]   ;;  %v4629_v33 = vld [vmem:[#allocation5 + $0x188] ss:$16 sps:$4 sm:$0xff]  }
 0x2dd   :  { %2974 = vmatpush2.bf16.msra.mxu1 %v4551_v34  ;;  %v4632_v34 = vld [vmem:[#allocation5 + $0x388] ss:$16 sps:$4 sm:$0xff]  }
 0x2de   :  { %3015 = vmatpush2.bf16.msra.mxu0 %v4554_v3  ;;  %2975 = vmatprep.subr.bf16.mxu1 %v4559_v4  ;;  %v4637_v3 = vld [vmem:[#allocation5 + $0x16c] ss:$16 sps:$4 sm:$0xff]  }
 0x2df   :  { %3016 = vmatprep.subr.bf16.mxu0 %v4562_v40  ;;  %v4640_v4 = vld [vmem:[#allocation5 + $0x36c] ss:$16 sps:$4 sm:$0xff]   ;;  %v4635_v40 = vld [vmem:[#allocation5 + $0x168] ss:$16 sps:$4 sm:$0xff]  }
 0x2e1   :  { %2976 = vmatpush2.bf16.msra.mxu1 %v4557_v14  ;;  %v4638_v14 = vld [vmem:[#allocation5 + $0x368] ss:$16 sps:$4 sm:$0xff]  }
 0x2e2   :  { %3017 = vmatpush2.bf16.msra.mxu0 %v4560_v41  ;;  %3027 = vmatprep.subr.bf16.mxu1 %v4565_v46  ;;  %v4643_v41 = vld [vmem:[#allocation5 + $0x14c] ss:$16 sps:$4 sm:$0xff]  }
 0x2e3   :  { %3068 = vmatprep.subr.bf16.mxu0 %v4568_v61  ;;  %v4646_v46 = vld [vmem:[#allocation5 + $0x34c] ss:$16 sps:$4 sm:$0xff]   ;;  %v4641_v61 = vld [vmem:[#allocation5 + $0x148] ss:$16 sps:$4 sm:$0xff]  }
 0x2e4   :  { %2978 = vmatmul.mubr.bf16.vlgmr.msra.gmra.mxu1 %v5332_v63 }
 0x2e5   :  { %3019 = vmatmul.mubr.bf16.vlgmr.msra.gmra.mxu0 %v5336_v32  ;;  %3028 = vmatpush1.bf16.msra.mxu1 %v4563_v23  ;;  %v4644_v23 = vld [vmem:[#allocation5 + $0x348] ss:$16 sps:$4 sm:$0xff]  }
 0x2e6   :  { %3059 = vmatprep.mubr.bf16.mxu1 %v5288_v49  ;;  %3069 = vmatpush1.bf16.msra.mxu0 %v4566_v47  ;;  %v4584_v49 = vld [vmem:[#allocation5 + $0x288] ss:$16 sps:$4 sm:$0xff]   ;;  %v4649_v47 = vld [vmem:[#allocation5 + $0x12c] ss:$16 sps:$4 sm:$0xff]  }
 0x2e7   :  { %3100 = vmatprep.mubr.bf16.mxu0 %v5290_v55  ;;  %3029 = vmatprep.subr.bf16.mxu1 %v4571_v43  ;;  %v4587_v55 = vld [vmem:[#allocation5 + $0x68] ss:$16 sps:$4 sm:$0xff]   ;;  %v4652_v43 = vld [vmem:[#allocation5 + $0x32c] ss:$16 sps:$4 sm:$0xff]  }
 0x2e8   :  { %3070 = vmatprep.subr.bf16.mxu0 %v4574_v45  ;;  %v4647_v45 = vld [vmem:[#allocation5 + $0x128] ss:$16 sps:$4 sm:$0xff]  }
 0x2e9   :  { %3030 = vmatpush1.bf16.msra.mxu1 %v4569_v48  ;;  %v4650_v48 = vld [vmem:[#allocation5 + $0x328] ss:$16 sps:$4 sm:$0xff]  }
 0x2ea   :  { %3071 = vmatpush1.bf16.msra.mxu0 %v4572_v18  ;;  %3031 = vmatprep.subr.bf16.mxu1 %v4577_v31  ;;  %v4655_v18 = vld [vmem:[#allocation5 + $0x10c] ss:$16 sps:$4 sm:$0xff]  }
 0x2eb   :  { %3072 = vmatprep.subr.bf16.mxu0 %v4580_v16  ;;  %v4658_v31 = vld [vmem:[#allocation5 + $0x30c] ss:$16 sps:$4 sm:$0xff]   ;;  %v4653_v16 = vld [vmem:[#allocation5 + $0x108] ss:$16 sps:$4 sm:$0xff]  }
 0x2ed   :  { %3032 = vmatpush1.bf16.msra.mxu1 %v4575_v24  ;;  %v4656_v24 = vld [vmem:[#allocation5 + $0x308] ss:$16 sps:$4 sm:$0xff]  }
 0x2ee   :  { %3073 = vmatpush1.bf16.msra.mxu0 %v4578_v42  ;;  %3033 = vmatprep.subr.bf16.mxu1 %v4583_v50  ;;  %v4661_v42 = vld [vmem:[#allocation5 + $0x4ec] ss:$16 sps:$4 sm:$0xff]  }
 0x2ef   :  { %3074 = vmatprep.subr.bf16.mxu0 %v4586_v20  ;;  %v4664_v50 = vld [vmem:[#allocation5 + $0x6ec] ss:$16 sps:$4 sm:$0xff]   ;;  %v4659_v20 = vld [vmem:[#allocation5 + $0x4e8] ss:$16 sps:$4 sm:$0xff]  }
 0x2f1   :  { %3034 = vmatpush1.bf16.msra.mxu1 %v4581_v56  ;;  %v4662_v56 = vld [vmem:[#allocation5 + $0x6e8] ss:$16 sps:$4 sm:$0xff]  }
 0x2f2   :  { %3075 = vmatpush1.bf16.msra.mxu0 %v4584_v49  ;;  %3035 = vmatprep.subr.bf16.mxu1 %v4589_v58  ;;  %v4667_v49 = vld [vmem:[#allocation5 + $0x4cc] ss:$16 sps:$4 sm:$0xff]  }
 0x2f3   :  { %3076 = vmatprep.subr.bf16.mxu0 %v4592_v59  ;;  %v4670_v58 = vld [vmem:[#allocation5 + $0x6cc] ss:$16 sps:$4 sm:$0xff]   ;;  %v4665_v59 = vld [vmem:[#allocation5 + $0x4c8] ss:$16 sps:$4 sm:$0xff]  }
 0x2f5   :  { %3036 = vmatpush1.bf16.msra.mxu1 %v4587_v55  ;;  %v4668_v55 = vld [vmem:[#allocation5 + $0x6c8] ss:$16 sps:$4 sm:$0xff]  }
 0x2f6   :  { %3077 = vmatpush1.bf16.msra.mxu0 %v4590_v60  ;;  %3037 = vmatprep.subr.bf16.mxu1 %v4595_v2  ;;  %v4673_v60 = vld [vmem:[#allocation5 + $0x4ac] ss:$16 sps:$4 sm:$0xff]  }
 0x2f7   :  { %3078 = vmatprep.subr.bf16.mxu0 %v4598_v5  ;;  %v4676_v2 = vld [vmem:[#allocation5 + $0x6ac] ss:$16 sps:$4 sm:$0xff]   ;;  %v4671_v5 = vld [vmem:[#allocation5 + $0x4a8] ss:$16 sps:$4 sm:$0xff]  }
 0x2f9   :  { %3038 = vmatpush1.bf16.msra.mxu1 %v4593_v35  ;;  %v4679_v35 = vld [vmem:[#allocation5 + $0x48c] ss:$16 sps:$4 sm:$0xff]  }
 0x2fa   :  { %3079 = vmatpush1.bf16.msra.mxu0 %v4596_v27  ;;  %3039 = vmatprep.subr.bf16.mxu1 %v4601_v36  ;;  %v4677_v27 = vld [vmem:[#allocation5 + $0x488] ss:$16 sps:$4 sm:$0xff]   ;;  %v4685_v36 = vld [vmem:[#allocation5 + $0x46c] ss:$16 sps:$4 sm:$0xff]  }
 0x2fb   :  { %3080 = vmatprep.subr.bf16.mxu0 %v4604_v6  ;;  %v4688_v6 = vld [vmem:[#allocation5 + $0x66c] ss:$16 sps:$4 sm:$0xff]  }
 0x2fd   :  { %3040 = vmatpush1.bf16.msra.mxu1 %v4599_v9  ;;  %v4686_v9 = vld [vmem:[#allocation5 + $0x668] ss:$16 sps:$4 sm:$0xff]  }
 0x2fe   :  { %3081 = vmatpush1.bf16.msra.mxu0 %v4602_v10  ;;  %3041 = vmatprep.subr.bf16.mxu1 %v4607_v11  ;;  %v4691_v10 = vld [vmem:[#allocation5 + $0x44c] ss:$16 sps:$4 sm:$0xff]  }
 0x2ff   :  { %3082 = vmatprep.subr.bf16.mxu0 %v4610_v12  ;;  %v4694_v11 = vld [vmem:[#allocation5 + $0x64c] ss:$16 sps:$4 sm:$0xff]   ;;  %v4689_v12 = vld [vmem:[#allocation5 + $0x448] ss:$16 sps:$4 sm:$0xff]  }
 0x301   :  { %3042 = vmatpush1.bf16.msra.mxu1 %v4605_v13  ;;  %v4692_v13 = vld [vmem:[#allocation5 + $0x648] ss:$16 sps:$4 sm:$0xff]  }
 0x302   :  { %3083 = vmatpush1.bf16.msra.mxu0 %v4608_v38  ;;  %3043 = vmatprep.subr.bf16.mxu1 %v4613_v15  ;;  %v4697_v38 = vld [vmem:[#allocation5 + $0x42c] ss:$16 sps:$4 sm:$0xff]  }
 0x303   :  { %3084 = vmatprep.subr.bf16.mxu0 %v4616_v39  ;;  %v4700_v15 = vld [vmem:[#allocation5 + $0x62c] ss:$16 sps:$4 sm:$0xff]   ;;  %v4695_v39 = vld [vmem:[#allocation5 + $0x428] ss:$16 sps:$4 sm:$0xff]  }
 0x305   :  { %3044 = vmatpush2.bf16.msra.mxu1 %v4611_v17  ;;  %v4698_v17 = vld [vmem:[#allocation5 + $0x628] ss:$16 sps:$4 sm:$0xff]  }
 0x306   :  { %3085 = vmatpush2.bf16.msra.mxu0 %v4614_v53  ;;  %3045 = vmatprep.subr.bf16.mxu1 %v4619_v54  ;;  %v4703_v53 = vld [vmem:[#allocation5 + $0x40c] ss:$16 sps:$4 sm:$0xff]  }
 0x307   :  { %3086 = vmatprep.subr.bf16.mxu0 %v4622_v21  ;;  %v4706_v54 = vld [vmem:[#allocation5 + $0x60c] ss:$16 sps:$4 sm:$0xff]   ;;  %v4701_v21 = vld [vmem:[#allocation5 + $0x408] ss:$16 sps:$4 sm:$0xff]  }
 0x309   :  { %3046 = vmatpush2.bf16.msra.mxu1 %v4617_v25  ;;  %v4704_v25 = vld [vmem:[#allocation5 + $0x608] ss:$16 sps:$4 sm:$0xff]  }
 0x30a   :  { %3087 = vmatpush2.bf16.msra.mxu0 %v4620_v19  ;;  %3047 = vmatprep.subr.bf16.mxu1 %v4625_v26  ;;  %v4709_v19 = vld [vmem:[#allocation5 + $0x5ec] ss:$16 sps:$4 sm:$0xff]  }
 0x30b   :  { %3088 = vmatprep.subr.bf16.mxu0 %v4628_v28  ;;  %v4712_v26 = vld [vmem:[#allocation5 + $0x7ec] ss:$16 sps:$4 sm:$0xff]   ;;  %v4707_v28 = vld [vmem:[#allocation5 + $0x5e8] ss:$16 sps:$4 sm:$0xff]  }
 0x30d   :  { %3048 = vmatpush2.bf16.msra.mxu1 %v4623_v29  ;;  %v4710_v29 = vld [vmem:[#allocation5 + $0x7e8] ss:$16 sps:$4 sm:$0xff]  }
 0x30e   :  { %3089 = vmatpush2.bf16.msra.mxu0 %v4626_v30  ;;  %3049 = vmatprep.subr.bf16.mxu1 %v4631_v37  ;;  %v4715_v30 = vld [vmem:[#allocation5 + $0x5cc] ss:$16 sps:$4 sm:$0xff]  }
 0x30f   :  { %3090 = vmatprep.subr.bf16.mxu0 %v4634_v57  ;;  %v4718_v37 = vld [vmem:[#allocation5 + $0x7cc] ss:$16 sps:$4 sm:$0xff]   ;;  %v4713_v57 = vld [vmem:[#allocation5 + $0x5c8] ss:$16 sps:$4 sm:$0xff]  }
 0x311   :  { %3050 = vmatpush2.bf16.msra.mxu1 %v4629_v33  ;;  %v4716_v33 = vld [vmem:[#allocation5 + $0x7c8] ss:$16 sps:$4 sm:$0xff]  }
 0x312   :  { %3091 = vmatpush2.bf16.msra.mxu0 %v4632_v34  ;;  %3051 = vmatprep.subr.bf16.mxu1 %v4637_v3  ;;  %v4721_v34 = vld [vmem:[#allocation5 + $0x5ac] ss:$16 sps:$4 sm:$0xff]  }
 0x313   :  { %3092 = vmatprep.subr.bf16.mxu0 %v4640_v4  ;;  %v4724_v3 = vld [vmem:[#allocation5 + $0x7ac] ss:$16 sps:$4 sm:$0xff]   ;;  %v4719_v4 = vld [vmem:[#allocation5 + $0x5a8] ss:$16 sps:$4 sm:$0xff]  }
 0x315   :  { %3052 = vmatpush2.bf16.msra.mxu1 %v4635_v40  ;;  %v4722_v40 = vld [vmem:[#allocation5 + $0x7a8] ss:$16 sps:$4 sm:$0xff]  }
 0x316   :  { %3093 = vmatpush2.bf16.msra.mxu0 %v4638_v14  ;;  %3053 = vmatprep.subr.bf16.mxu1 %v4643_v41  ;;  %v4727_v14 = vld [vmem:[#allocation5 + $0x58c] ss:$16 sps:$4 sm:$0xff]  }
 0x317   :  { %3094 = vmatprep.subr.bf16.mxu0 %v4646_v46  ;;  %v4730_v41 = vld [vmem:[#allocation5 + $0x78c] ss:$16 sps:$4 sm:$0xff]   ;;  %v4725_v46 = vld [vmem:[#allocation5 + $0x588] ss:$16 sps:$4 sm:$0xff]  }
 0x319   :  { %3054 = vmatpush2.bf16.msra.mxu1 %v4641_v61  ;;  %v4728_v61 = vld [vmem:[#allocation5 + $0x788] ss:$16 sps:$4 sm:$0xff]  }
 0x31a   :  { %3095 = vmatpush2.bf16.msra.mxu0 %v4644_v23  ;;  %3055 = vmatprep.subr.bf16.mxu1 %v4649_v47  ;;  %v4733_v23 = vld [vmem:[#allocation5 + $0x56c] ss:$16 sps:$4 sm:$0xff]  }
 0x31b   :  { %3096 = vmatprep.subr.bf16.mxu0 %v4652_v43  ;;  %v4736_v47 = vld [vmem:[#allocation5 + $0x76c] ss:$16 sps:$4 sm:$0xff]   ;;  %v4731_v43 = vld [vmem:[#allocation5 + $0x568] ss:$16 sps:$4 sm:$0xff]  }
 0x31d   :  { %3056 = vmatpush2.bf16.msra.mxu1 %v4647_v45  ;;  %v4734_v45 = vld [vmem:[#allocation5 + $0x768] ss:$16 sps:$4 sm:$0xff]  }
 0x31e   :  { %3097 = vmatpush2.bf16.msra.mxu0 %v4650_v48  ;;  %3057 = vmatprep.subr.bf16.mxu1 %v4655_v18  ;;  %v4739_v48 = vld [vmem:[#allocation5 + $0x54c] ss:$16 sps:$4 sm:$0xff]  }
 0x31f   :  { %3098 = vmatprep.subr.bf16.mxu0 %v4658_v31  ;;  %v4742_v18 = vld [vmem:[#allocation5 + $0x74c] ss:$16 sps:$4 sm:$0xff]   ;;  %v4737_v31 = vld [vmem:[#allocation5 + $0x548] ss:$16 sps:$4 sm:$0xff]  }
 0x321   :  { %3058 = vmatpush2.bf16.msra.mxu1 %v4653_v16  ;;  %v4740_v16 = vld [vmem:[#allocation5 + $0x748] ss:$16 sps:$4 sm:$0xff]  }
 0x322   :  { %3099 = vmatpush2.bf16.msra.mxu0 %v4656_v24  ;;  %3109 = vmatprep.subr.bf16.mxu1 %v4661_v42  ;;  %v4745_v24 = vld [vmem:[#allocation5 + $0x52c] ss:$16 sps:$4 sm:$0xff]  }
 0x323   :  { %3150 = vmatprep.subr.bf16.mxu0 %v4664_v50  ;;  %v4748_v42 = vld [vmem:[#allocation5 + $0x72c] ss:$16 sps:$4 sm:$0xff]   ;;  %v4743_v50 = vld [vmem:[#allocation5 + $0x528] ss:$16 sps:$4 sm:$0xff]  }
 0x324   :  { %3060 = vmatmul.mubr.bf16.vlgmr.msra.gmra.mxu1 %v5303_v7  ;;  %v4674_v7 = vld [vmem:[#allocation5 + $0x6a8] ss:$16 sps:$4 sm:$0xff]  }
 0x325   :  { %3101 = vmatmul.mubr.bf16.vlgmr.msra.gmra.mxu0 %v5305_v8  ;;  %3110 = vmatpush1.bf16.msra.mxu1 %v4659_v20  ;;  %v4682_v8 = vld [vmem:[#allocation5 + $0x68c] ss:$16 sps:$4 sm:$0xff]   ;;  %v4746_v20 = vld [vmem:[#allocation5 + $0x728] ss:$16 sps:$4 sm:$0xff]  }
 0x326   :  { %3141 = vmatprep.mubr.bf16.mxu1 %v5324_v62  ;;  %3151 = vmatpush1.bf16.msra.mxu0 %v4662_v56  ;;  %v4680_v62 = vld [vmem:[#allocation5 + $0x688] ss:$16 sps:$4 sm:$0xff]   ;;  %v4751_v56 = vld [vmem:[#allocation5 + $0x50c] ss:$16 sps:$4 sm:$0xff]  }
 0x327   :  { %3182 = vmatprep.mubr.bf16.mxu0 %v5326_v0  ;;  %3111 = vmatprep.subr.bf16.mxu1 %v4667_v49  ;;  %v4683_v0 = vld [vmem:[#allocation5 + $0x468] ss:$16 sps:$4 sm:$0xff]   ;;  %v4754_v49 = vld [vmem:[#allocation5 + $0x70c] ss:$16 sps:$4 sm:$0xff]  }
 0x328   :  { %3152 = vmatprep.subr.bf16.mxu0 %v4670_v58  ;;  %v4749_v58 = vld [vmem:[#allocation5 + $0x508] ss:$16 sps:$4 sm:$0xff]  }
 0x329   :  { %3112 = vmatpush1.bf16.msra.mxu1 %v4665_v59  ;;  %v4752_v59 = vld [vmem:[#allocation5 + $0x708] ss:$16 sps:$4 sm:$0xff]  }
 0x32a   :  { %3153 = vmatpush1.bf16.msra.mxu0 %v4668_v55  ;;  %3113 = vmatprep.subr.bf16.mxu1 %v4673_v60  ;;  %v4757_v55 = vld [vmem:[#allocation7 + $0x74] ss:$8 sps:$4 sm:$0xff]   ;;  %v4755_v60 = vld [vmem:[#allocation7 + $0x70] ss:$8 sps:$4 sm:$0xff]  }
 0x32b   :  { %3154 = vmatprep.subr.bf16.mxu0 %v4676_v2  ;;  %v4760_v2 = vld [vmem:[#allocation7 + $0x64] ss:$8 sps:$4 sm:$0xff]  }
 0x32d   :  { %3114 = vmatpush1.bf16.msra.mxu1 %v4671_v5 }
 0x32e   :  { %3155 = vmatpush1.bf16.msra.mxu0 %v4674_v7  ;;  %3115 = vmatprep.subr.bf16.mxu1 %v4679_v35 }
 0x32f   :  { %3156 = vmatprep.subr.bf16.mxu0 %v4682_v8  ;;  %v4758_v8 = vld [vmem:[#allocation7 + $0x60] ss:$8 sps:$4 sm:$0xff]  }
 0x331   :  { %3116 = vmatpush1.bf16.msra.mxu1 %v4677_v27 }
 0x332   :  { %3157 = vmatpush1.bf16.msra.mxu0 %v4680_v62  ;;  %3117 = vmatprep.subr.bf16.mxu1 %v4685_v36  ;;  %v4763_v36 = vld [vmem:[#allocation7 + $0x54] ss:$8 sps:$4 sm:$0xff]  }
 0x333   :  { %3158 = vmatprep.subr.bf16.mxu0 %v4688_v6 }
 0x335   :  { %3118 = vmatpush1.bf16.msra.mxu1 %v4683_v0 }
 0x336   :  { %3159 = vmatpush1.bf16.msra.mxu0 %v4686_v9  ;;  %3119 = vmatprep.subr.bf16.mxu1 %v4691_v10  ;;  %v4761_v9 = vld [vmem:[#allocation7 + $0x50] ss:$8 sps:$4 sm:$0xff]  }
 0x337   :  { %3160 = vmatprep.subr.bf16.mxu0 %v4694_v11  ;;  %v4766_v11 = vld [vmem:[#allocation7 + $0x44] ss:$8 sps:$4 sm:$0xff]  }
 0x339   :  { %3120 = vmatpush1.bf16.msra.mxu1 %v4689_v12  ;;  %v4803_v12 = vld [vmem:[#allocation7 + $0x170] ss:$8 sps:$4 sm:$0xff]  }
 0x33a   :  { %3161 = vmatpush1.bf16.msra.mxu0 %v4692_v13  ;;  %3121 = vmatprep.subr.bf16.mxu1 %v4697_v38  ;;  %v4808_v13 = vld [vmem:[#allocation7 + $0x164] ss:$8 sps:$4 sm:$0xff]   ;;  %v4764_v38 = vld [vmem:[#allocation7 + $0x40] ss:$8 sps:$4 sm:$0xff]  }
 0x33b   :  { %3162 = vmatprep.subr.bf16.mxu0 %v4700_v15  ;;  %v4769_v15 = vld [vmem:[#allocation7 + $0x34] ss:$8 sps:$4 sm:$0xff]  }
 0x33d   :  { %3122 = vmatpush1.bf16.msra.mxu1 %v4695_v39  ;;  %v4806_v39 = vld [vmem:[#allocation7 + $0x160] ss:$8 sps:$4 sm:$0xff]  }
 0x33e   :  { %3163 = vmatpush1.bf16.msra.mxu0 %v4698_v17  ;;  %3123 = vmatprep.subr.bf16.mxu1 %v4703_v53  ;;  %v4811_v17 = vld [vmem:[#allocation7 + $0x154] ss:$8 sps:$4 sm:$0xff]   ;;  %v4767_v53 = vld [vmem:[#allocation7 + $0x30] ss:$8 sps:$4 sm:$0xff]  }
 0x33f   :  { %3164 = vmatprep.subr.bf16.mxu0 %v4706_v54  ;;  %v4772_v54 = vld [vmem:[#allocation7 + $0x24] ss:$8 sps:$4 sm:$0xff]  }
 0x341   :  { %3124 = vmatpush1.bf16.msra.mxu1 %v4701_v21  ;;  %v4809_v21 = vld [vmem:[#allocation7 + $0x150] ss:$8 sps:$4 sm:$0xff]  }
 0x342   :  { %3165 = vmatpush1.bf16.msra.mxu0 %v4704_v25  ;;  %3125 = vmatprep.subr.bf16.mxu1 %v4709_v19  ;;  %v4814_v25 = vld [vmem:[#allocation7 + $0x144] ss:$8 sps:$4 sm:$0xff]   ;;  %v4770_v19 = vld [vmem:[#allocation7 + $0x20] ss:$8 sps:$4 sm:$0xff]  }
 0x343   :  { %3166 = vmatprep.subr.bf16.mxu0 %v4712_v26  ;;  %v4775_v26 = vld [vmem:[#allocation7 + $0x14] ss:$8 sps:$4 sm:$0xff]  }
 0x345   :  { %3126 = vmatpush2.bf16.msra.mxu1 %v4707_v28  ;;  %v4812_v28 = vld [vmem:[#allocation7 + $0x140] ss:$8 sps:$4 sm:$0xff]  }
 0x346   :  { %3167 = vmatpush2.bf16.msra.mxu0 %v4710_v29  ;;  %3127 = vmatprep.subr.bf16.mxu1 %v4715_v30  ;;  %v4817_v29 = vld [vmem:[#allocation7 + $0x134] ss:$8 sps:$4 sm:$0xff]   ;;  %v4773_v30 = vld [vmem:[#allocation7 + $0x10] ss:$8 sps:$4 sm:$0xff]  }
 0x347   :  { %3168 = vmatprep.subr.bf16.mxu0 %v4718_v37  ;;  %v4778_v37 = vld [vmem:[#allocation7 + $0x4] ss:$8 sps:$4 sm:$0xff]  }
 0x349   :  { %3128 = vmatpush2.bf16.msra.mxu1 %v4713_v57  ;;  %v4815_v57 = vld [vmem:[#allocation7 + $0x130] ss:$8 sps:$4 sm:$0xff]  }
 0x34a   :  { %3169 = vmatpush2.bf16.msra.mxu0 %v4716_v33  ;;  %3129 = vmatprep.subr.bf16.mxu1 %v4721_v34  ;;  %v4820_v33 = vld [vmem:[#allocation7 + $0x124] ss:$8 sps:$4 sm:$0xff]   ;;  %v4776_v34 = vld [vmem:[#allocation7] ss:$8 sps:$4 sm:$0xff]  }
 0x34b   :  { %3170 = vmatprep.subr.bf16.mxu0 %v4724_v3  ;;  %v4781_v3 = vld [vmem:[#allocation7 + $0xf4] ss:$8 sps:$4 sm:$0xff]  }
 0x34d   :  { %3130 = vmatpush2.bf16.msra.mxu1 %v4719_v4  ;;  %v4818_v4 = vld [vmem:[#allocation7 + $0x120] ss:$8 sps:$4 sm:$0xff]  }
 0x34e   :  { %3171 = vmatpush2.bf16.msra.mxu0 %v4722_v40  ;;  %3131 = vmatprep.subr.bf16.mxu1 %v4727_v14  ;;  %v4823_v40 = vld [vmem:[#allocation7 + $0x114] ss:$8 sps:$4 sm:$0xff]   ;;  %v4779_v14 = vld [vmem:[#allocation7 + $0xf0] ss:$8 sps:$4 sm:$0xff]  }
 0x34f   :  { %3172 = vmatprep.subr.bf16.mxu0 %v4730_v41  ;;  %v4784_v41 = vld [vmem:[#allocation7 + $0xe4] ss:$8 sps:$4 sm:$0xff]  }
 0x351   :  { %3132 = vmatpush2.bf16.msra.mxu1 %v4725_v46  ;;  %v4821_v46 = vld [vmem:[#allocation7 + $0x110] ss:$8 sps:$4 sm:$0xff]  }
 0x352   :  { %3173 = vmatpush2.bf16.msra.mxu0 %v4728_v61  ;;  %3133 = vmatprep.subr.bf16.mxu1 %v4733_v23  ;;  %v4826_v61 = vld [vmem:[#allocation7 + $0x104] ss:$8 sps:$4 sm:$0xff]   ;;  %v4782_v23 = vld [vmem:[#allocation7 + $0xe0] ss:$8 sps:$4 sm:$0xff]  }
 0x353   :  { %3174 = vmatprep.subr.bf16.mxu0 %v4736_v47  ;;  %v4787_v47 = vld [vmem:[#allocation7 + $0xd4] ss:$8 sps:$4 sm:$0xff]  }
 0x355   :  { %3134 = vmatpush2.bf16.msra.mxu1 %v4731_v43  ;;  %v4824_v43 = vld [vmem:[#allocation7 + $0x100] ss:$8 sps:$4 sm:$0xff]  }
 0x356   :  { %3175 = vmatpush2.bf16.msra.mxu0 %v4734_v45  ;;  %3135 = vmatprep.subr.bf16.mxu1 %v4739_v48  ;;  %v4829_v45 = vld [vmem:[#allocation7 + $0x1f4] ss:$8 sps:$4 sm:$0xff]   ;;  %v4785_v48 = vld [vmem:[#allocation7 + $0xd0] ss:$8 sps:$4 sm:$0xff]  }
 0x357   :  { %3176 = vmatprep.subr.bf16.mxu0 %v4742_v18  ;;  %v4790_v18 = vld [vmem:[#allocation7 + $0xc4] ss:$8 sps:$4 sm:$0xff]  }
 0x359   :  { %3136 = vmatpush2.bf16.msra.mxu1 %v4737_v31  ;;  %v4827_v31 = vld [vmem:[#allocation7 + $0x1f0] ss:$8 sps:$4 sm:$0xff]  }
 0x35a   :  { %3177 = vmatpush2.bf16.msra.mxu0 %v4740_v16  ;;  %3137 = vmatprep.subr.bf16.mxu1 %v4745_v24  ;;  %v4832_v16 = vld [vmem:[#allocation7 + $0x1e4] ss:$8 sps:$4 sm:$0xff]   ;;  %v4788_v24 = vld [vmem:[#allocation7 + $0xc0] ss:$8 sps:$4 sm:$0xff]  }
 0x35b   :  { %3178 = vmatprep.subr.bf16.mxu0 %v4748_v42  ;;  %v4793_v42 = vld [vmem:[#allocation7 + $0xb4] ss:$8 sps:$4 sm:$0xff]  }
 0x35d   :  { %3138 = vmatpush2.bf16.msra.mxu1 %v4743_v50  ;;  %v4830_v50 = vld [vmem:[#allocation7 + $0x1e0] ss:$8 sps:$4 sm:$0xff]  }
 0x35e   :  { %3179 = vmatpush2.bf16.msra.mxu0 %v4746_v20  ;;  %3139 = vmatprep.subr.bf16.mxu1 %v4751_v56  ;;  %v4835_v20 = vld [vmem:[#allocation7 + $0x1d4] ss:$8 sps:$4 sm:$0xff]   ;;  %v4791_v56 = vld [vmem:[#allocation7 + $0xb0] ss:$8 sps:$4 sm:$0xff]  }
 0x35f   :  { %3180 = vmatprep.subr.bf16.mxu0 %v4754_v49  ;;  %v4796_v49 = vld [vmem:[#allocation7 + $0xa4] ss:$8 sps:$4 sm:$0xff]  }
 0x361   :  { %3140 = vmatpush2.bf16.msra.mxu1 %v4749_v58  ;;  %v4833_v58 = vld [vmem:[#allocation7 + $0x1d0] ss:$8 sps:$4 sm:$0xff]  }
 0x362   :  { %3181 = vmatpush2.bf16.msra.mxu0 %v4752_v59  ;;  %3635 = vmatprep.subr.bf16.mxu1 %v4757_v55  ;;  %v4838_v59 = vld [vmem:[#allocation7 + $0x1c4] ss:$8 sps:$4 sm:$0xff]   ;;  %v4794_v55 = vld [vmem:[#allocation7 + $0xa0] ss:$8 sps:$4 sm:$0xff]  }
 0x364   :  { %3142 = vmatmul.mubr.bf16.vlgmr.msra.gmra.mxu1 %v5332_v63  ;;  %v2897_v5 = vpop.f32.mrf.mxu1 }
 0x365   :  { %v2938_v7 = vpop.f32.mrf.mxu0  ;;  %3183 = vmatmul.mubr.bf16.vlgmr.msra.gmra.mxu0 %v5336_v32  ;;  %3636 = vmatpush1.bf16.msra.mxu1 %v4755_v60  ;;  %v4805_v32 = vld [vmem:[#allocation7 + $0x174] ss:$8 sps:$4 sm:$0xff]  }
 0x366   :  { %v5348_v35 = vadd.f32 %v2938_v7, %v2897_v5  ;;  %v5350_v27 = vpop.f32.mrf.mxu1  ;;  %3637 = vmatprep.subr.bf16.mxu1 %v4760_v2  ;;  %3676 = vmatprep.subr.bf16.mxu0 %v4805_v32  ;;  %v4799_v60 = vld [vmem:[#allocation7 + $0x94] ss:$8 sps:$4 sm:$0xff]   ;;  %v4836_v2 = vld [vmem:[#allocation7 + $0x1c0] ss:$8 sps:$4 sm:$0xff]   ;;  %v4797_v5 = vld [vmem:[#allocation7 + $0x90] ss:$8 sps:$4 sm:$0xff]  }
 0x367   :  { %v5352_v62 = vpop.f32.mrf.mxu0  ;;  %3677 = vmatpush1.bf16.msra.mxu0 %v4803_v12  ;;  %v4802_v7 = vld [vmem:[#allocation7 + $0x84] ss:$8 sps:$4 sm:$0xff]   ;;  %v4839_v32 = vld [vmem:[#allocation7 + $0x1b0] ss:$8 sps:$4 sm:$0xff]  }
 0x368   :  { %v2901_v6 = vpop.f32.mrf.mxu1  ;;  %3678 = vmatprep.subr.bf16.mxu0 %v4808_v13 }
 0x369   :  { %v2942_v0 = vpop.f32.mrf.mxu0  ;;  %3638 = vmatpush1.bf16.msra.mxu1 %v4758_v8  ;;  %v4800_v8 = vld [vmem:[#allocation7 + $0x80] ss:$8 sps:$4 sm:$0xff]  }
 0x36a   :  { %v2902_v10 = vpop.f32.mrf.mxu1  ;;  %3639 = vmatprep.subr.bf16.mxu1 %v4763_v36  ;;  %v5357_v36 = vld [vmem:[%s5507_s11] sm:$0xf] }
 0x36b   :  { %v2943_v63 = vpop.f32.mrf.mxu0  ;;  %3679 = vmatpush1.bf16.msra.mxu0 %v4806_v39  ;;  %v5362_v0 = vld [vmem:[%s5508_s12] sm:$0xf]  ;;  %v2941_v10 = vadd.f32 %v5352_v62, %v5350_v27  ;;  %v3196_v12 = vrot.slane %v5357_v36, %v5165_v51  ;;  %v4844_v62 = vld [vmem:[#allocation7 + $0x1a4] ss:$8 sps:$4 sm:$0xff]  }
 0x36c   :  { %3680 = vmatprep.subr.bf16.mxu0 %v4811_v17 }
 0x36d   :  { %3640 = vmatpush1.bf16.msra.mxu1 %v4761_v9  ;;  %v4841_v9 = vld [vmem:[#allocation7 + $0x1b4] ss:$8 sps:$4 sm:$0xff]  }
 0x36e   :  { %3641 = vmatprep.subr.bf16.mxu1 %v4766_v11 }
 0x36f   :  { %3681 = vmatpush1.bf16.msra.mxu0 %v4809_v21  ;;  %v3226_v21 = vrot.slane %v5362_v0, %v5171_v1 }
 0x370   :  { %3682 = vmatprep.subr.bf16.mxu0 %v4814_v25 }
 0x371   :  { %3642 = vmatpush1.bf16.msra.mxu1 %v4764_v38 }
 0x372   :  { %3643 = vmatprep.subr.bf16.mxu1 %v4769_v15  ;;  %v3222_v15 = vrot.slane %v5362_v0, %v5165_v51 }
 0x373   :  { %3683 = vmatpush1.bf16.msra.mxu0 %v4812_v28 }
 0x374   :  { %3684 = vmatprep.subr.bf16.mxu0 %v4817_v29 }
 0x375   :  { %3644 = vmatpush1.bf16.msra.mxu1 %v4767_v53  ;;  %v3200_v53 = vrot.slane %v5357_v36, %v5171_v1 }
 0x376   :  { %3645 = vmatprep.subr.bf16.mxu1 %v4772_v54 }
 0x377   :  { %3685 = vmatpush1.bf16.msra.mxu0 %v4815_v57 }
 0x378   :  { %3686 = vmatprep.subr.bf16.mxu0 %v4820_v33  ;;  %v4845_v33 = vld [vmem:[#allocation7 + $0x190] ss:$8 sps:$4 sm:$0xff]  }
 0x379   :  { %3646 = vmatpush1.bf16.msra.mxu1 %v4770_v19  ;;  %v4842_v19 = vld [vmem:[#allocation7 + $0x1a0] ss:$8 sps:$4 sm:$0xff]  }
 0x37a   :  { %3647 = vmatprep.subr.bf16.mxu1 %v4775_v26 }
 0x37b   :  { %3687 = vmatpush1.bf16.msra.mxu0 %v4818_v4  ;;  %v4848_v4 = vld [vmem:[#allocation7 + $0x180] ss:$8 sps:$4 sm:$0xff]  }
 0x37c   :  { %3688 = vmatprep.subr.bf16.mxu0 %v4823_v40  ;;  %v4850_v40 = vld [vmem:[#allocation7 + $0x184] ss:$8 sps:$4 sm:$0xff]  }
 0x37d   :  { %3648 = vmatpush1.bf16.msra.mxu1 %v4773_v30 }
 0x37e   :  { %3649 = vmatprep.subr.bf16.mxu1 %v4778_v37  ;;  %v4847_v37 = vld [vmem:[#allocation7 + $0x194] ss:$8 sps:$4 sm:$0xff]  }
 0x37f   :  { %3689 = vmatpush1.bf16.msra.mxu0 %v4821_v46 }
 0x380   :  { %3690 = vmatprep.subr.bf16.mxu0 %v4826_v61 }
 0x381   :  { %3650 = vmatpush1.bf16.msra.mxu1 %v4776_v34 }
 0x382   :  { %3651 = vmatprep.subr.bf16.mxu1 %v4781_v3 }
 0x383   :  { %3691 = vmatpush1.bf16.msra.mxu0 %v4824_v43 }
 0x384   :  { %3692 = vmatprep.subr.bf16.mxu0 %v4829_v45 }
 0x385   :  { %3652 = vmatpush2.bf16.msra.mxu1 %v4779_v14 }
 0x386   :  { %3653 = vmatprep.subr.bf16.mxu1 %v4784_v41 }
 0x387   :  { %3693 = vmatpush2.bf16.msra.mxu0 %v4827_v31 }
 0x388   :  { %3694 = vmatprep.subr.bf16.mxu0 %v4832_v16  ;;  %v3778_v16 = vld [vmem:[%s5512_s16 + $0xf8] sm:$0xff] }
 0x389   :  { %3654 = vmatpush2.bf16.msra.mxu1 %v4782_v23 }
 0x38a   :  { %3655 = vmatprep.subr.bf16.mxu1 %v4787_v47 }
 0x38b   :  { %3695 = vmatpush2.bf16.msra.mxu0 %v4830_v50  ;;  %v3761_v50 = vld [vmem:[%s5512_s16 + $0x70] sm:$0xff] }
 0x38c   :  { %3696 = vmatprep.subr.bf16.mxu0 %v4835_v20  ;;  %v3776_v20 = vld [vmem:[%s5512_s16 + $0xe8] sm:$0xff] }
 0x38d   :  { %3656 = vmatpush2.bf16.msra.mxu1 %v4785_v48 }
 0x38e   :  { %3657 = vmatprep.subr.bf16.mxu1 %v4790_v18 }
 0x38f   :  { %3697 = vmatpush2.bf16.msra.mxu0 %v4833_v58  ;;  %v3759_v58 = vld [vmem:[%s5512_s16 + $0x60] sm:$0xff] }
 0x390   :  { %3698 = vmatprep.subr.bf16.mxu0 %v4838_v59  ;;  %v3774_v59 = vld [vmem:[%s5512_s16 + $0xd8] sm:$0xff] }
 0x391   :  { %3658 = vmatpush2.bf16.msra.mxu1 %v4788_v24  ;;  %v3762_v24 = vld [vmem:[%s5512_s16 + $0x78] sm:$0xff] }
 0x392   :  { %3659 = vmatprep.subr.bf16.mxu1 %v4793_v42  ;;  %v3777_v42 = vld [vmem:[%s5512_s16 + $0xf0] sm:$0xff] }
 0x393   :  { %3699 = vmatpush2.bf16.msra.mxu0 %v4836_v2  ;;  %v3757_v2 = vld [vmem:[%s5512_s16 + $0x50] sm:$0xff] }
 0x394   :  { %3700 = vmatprep.subr.bf16.mxu0 %v4841_v9  ;;  %v3770_v9 = vld [vmem:[%s5512_s16 + $0xb8] sm:$0xff] }
 0x395   :  { %3660 = vmatpush2.bf16.msra.mxu1 %v4791_v56  ;;  %v3760_v56 = vld [vmem:[%s5512_s16 + $0x68] sm:$0xff] }
 0x396   :  { %3661 = vmatprep.subr.bf16.mxu1 %v4796_v49  ;;  %v3775_v49 = vld [vmem:[%s5512_s16 + $0xe0] sm:$0xff] }
 0x397   :  { %3701 = vmatpush2.bf16.msra.mxu0 %v4839_v32 }
 0x398   :  { %3702 = vmatprep.subr.bf16.mxu0 %v4844_v62 }
 0x399   :  { %3662 = vmatpush2.bf16.msra.mxu1 %v4794_v55  ;;  %v3758_v55 = vld [vmem:[%s5512_s16 + $0x58] sm:$0xff] }
 0x39a   :  { %3663 = vmatprep.subr.bf16.mxu1 %v4799_v60  ;;  %v3773_v60 = vld [vmem:[%s5512_s16 + $0xd0] sm:$0xff] }
 0x39b   :  { %3703 = vmatpush2.bf16.msra.mxu0 %v4842_v19  ;;  %v3234_v19 = vrot.slane %v5362_v0, %v5174_v52 }
 0x39c   :  { %3704 = vmatprep.subr.bf16.mxu0 %v4847_v37 }
 0x39d   :  { %3664 = vmatpush2.bf16.msra.mxu1 %v4797_v5  ;;  %v3772_v5 = vld [vmem:[%s5512_s16 + $0xc8] sm:$0xff] }
 0x39e   :  { %3665 = vmatprep.subr.bf16.mxu1 %v4802_v7  ;;  %v3756_v7 = vld [vmem:[%s5512_s16 + $0x48] sm:$0xff] }
 0x39f   :  { %3705 = vmatpush2.bf16.msra.mxu0 %v4845_v33 }
 0x3a0   :  { %3706 = vmatprep.subr.bf16.mxu0 %v4850_v40 }
 0x3a1   :  { %3666 = vmatpush2.bf16.msra.mxu1 %v4800_v8  ;;  %v3771_v8 = vld [vmem:[%s5512_s16 + $0xc0] sm:$0xff] }
 0x3a2   :  { %4296 = vmatprep.subr.mxu1 %v3778_v16  ;;  %v3717_v16 = vld [vmem:[%s5510_s14] sm:$0x3] }
 0x3a3   :  { %3707 = vmatpush2.bf16.msra.mxu0 %v4848_v4 }
 0x3a4   :  { %v2979_v6 = vpop.f32.mrf.mxu1 }
 0x3a5   :  { %v2980_v63 = vadd.f32 %v2979_v6, %v5348_v35  ;;  %v3020_v11 = vpop.f32.mrf.mxu0  ;;  %v3755_v6 = vld [vmem:[%s5512_s16 + $0x40] sm:$0xff] }
 0x3a6   :  { %v2981_v13 = vpop.f32.mrf.mxu1 }
 0x3a7   :  { %v3021_v38 = vadd.f32 %v3020_v11, %v2980_v63  ;;  %v2982_v39 = vadd.f32 %v2981_v13, %v2941_v10  ;;  %v3022_v17 = vpop.f32.mrf.mxu0  ;;  %v3754_v10 = vld [vmem:[%s5512_s16 + $0x38] sm:$0xff]  ;;  %v3769_v63 = vld [vmem:[%s5512_s16 + $0xb0] sm:$0xff] }
 0x3a8   :  { %v2983_v27 = vpop.f32.mrf.mxu1  ;;  %v3753_v11 = vld [vmem:[%s5512_s16 + $0x30] sm:$0xff] }
 0x3a9   :  { %v3213_v35 = vmul.f32 %v3196_v12, %v3021_v38  ;;  %v3023_v54 = vadd.f32 %v3022_v17, %v2982_v39  ;;  %v3024_v25 = vpop.f32.mrf.mxu0 }
 0x3aa   :  { %v2984_v26 = vpop.f32.mrf.mxu1 }
 0x3ab   :  { %v3239_v28 = vadd.f32 %v3222_v15, %v3213_v35  ;;  %v3214_v29 = vmul.f32 %v3200_v53, %v3023_v54  ;;  %v3025_v30 = vpop.f32.mrf.mxu0  ;;  %v3204_v15 = vrot.slane %v5357_v36, %v5168_v44  ;;  %v3230_v53 = vrot.slane %v5362_v0, %v5168_v44  ;;  %v3767_v0 = vld [vmem:[%s5512_s16 + $0xa0] sm:$0xff] }
 0x3ac   :  { %v3208_v35 = vrot.slane %v5357_v36, %v5174_v52  ;;  %v3768_v36 = vld [vmem:[%s5512_s16 + $0xa8] sm:$0xff] }
 0x3ad   :  { %v3240_v57 = vadd.f32 %v3226_v21, %v3214_v29  ;;  %v3243_v34 = vmax.f32 %v3239_v28, 0.0  ;;  %v3752_v52 = vld [vmem:[%s5512_s16 + $0x28] sm:$0xff] }
 0x3af   :  { %v3244_v3 = vmax.f32 %v3240_v57, 0.0  ;;  %v3247_v41 = vpack.c.bf16 %v3243_v34, %v3243_v34 }
 0x3b1   :  { %v3248_v14 = vpack.c.bf16 %v3244_v3, %v3244_v3 }
 0x3b3   :  { %3667 = vmatprep.mubr.bf16.mxu1 %v3248_v14 }
 0x3b4   :  { %3668 = vmatmul.mubr.bf16.vlgmr.msra.gmra.mxu1 %v3247_v41  ;;  %v3751_v41 = vld [vmem:[%s5512_s16 + $0x20] sm:$0xff] }
 0x3b5   :  { %4297 = vmatpush3.msra.mxu1 %v3762_v24  ;;  %v3722_v24 = vrot.slane %v3717_v16, %v5165_v51 }
 0x3b6   :  { %4298 = vmatprep.subr.mxu1 %v3777_v42  ;;  %v3731_v42 = vld [vmem:[%s5511_s15] sm:$0x3] }
 0x3b7   :  { %4299 = vmatpush3.msra.mxu1 %v3761_v50 }
 0x3b8   :  { %4300 = vmatprep.subr.mxu1 %v3776_v20 }
 0x3b9   :  { %4301 = vmatpush3.msra.mxu1 %v3760_v56  ;;  %v3726_v56 = vrot.slane %v3717_v16, %v5171_v1 }
 0x3ba   :  { %4302 = vmatprep.subr.mxu1 %v3775_v49  ;;  %v3736_v49 = vrot.slane %v3731_v42, %v5165_v51  ;;  %v4289_v51 = vld [vmem:[%s5513_s17] ss:$0 sm:$0xff] }
 0x3bb   :  { %4303 = vmatpush3.msra.mxu1 %v3759_v58 }
 0x3bc   :  { %4304 = vmatprep.subr.mxu1 %v3774_v59 }
 0x3bd   :  { %4305 = vmatpush3.msra.mxu1 %v3758_v55 }
 0x3be   :  { %4306 = vmatprep.subr.mxu1 %v3773_v60  ;;  %v3740_v60 = vrot.slane %v3731_v42, %v5171_v1 }
 0x3bf   :  { %4307 = vmatpush3.msra.mxu1 %v3757_v2 }
 0x3c0   :  { %4308 = vmatprep.subr.mxu1 %v3772_v5 }
 0x3c1   :  { %4309 = vmatpush3.msra.mxu1 %v3756_v7 }
 0x3c2   :  { %4310 = vmatprep.subr.mxu1 %v3771_v8 }
 0x3c3   :  { %4311 = vmatpush3.msra.mxu1 %v3755_v6 }
 0x3c4   :  { %4312 = vmatprep.subr.mxu1 %v3770_v9 }
 0x3c5   :  { %4313 = vmatpush3.msra.mxu1 %v3754_v10 }
 0x3c6   :  { %4314 = vmatprep.subr.mxu1 %v3769_v63  ;;  %v3857_v63 = vand.u32 127, %v964_v22 }
 0x3c7   :  { %4315 = vmatpush3.msra.mxu1 %v3753_v11 }
 0x3c8   :  { %4316 = vmatprep.subr.mxu1 %v3768_v36  ;;  %v3862_v11 = vand.u32 3, %v3857_v63 }
 0x3c9   :  { %4317 = vmatpush3.msra.mxu1 %v3752_v52 }
 0x3ca   :  { %4318 = vmatprep.subr.mxu1 %v3767_v0  ;;  %vm3870_vm2 = vcmp.eq.s32.totalorder %v3862_v11, 0 }
 0x3cb   :  { %4319 = vmatpush3.msra.mxu1 %v3751_v41 }
 0x3e4   :  { %v3061_v46 = vpop.f32.mrf.mxu1 }
 0x3e5   :  { %v3102_v61 = vpop.f32.mrf.mxu0 }
 0x3e6   :  { %v3103_v23 = vadd.f32 %v3102_v61, %v3061_v46  ;;  %v3063_v47 = vpop.f32.mrf.mxu1  ;;  %v3766_v46 = vld [vmem:[%s5512_s16 + $0x98] sm:$0xff] }
 0x3e7   :  { %v3104_v43 = vpop.f32.mrf.mxu0  ;;  %4320 = vmatprep.subr.mxu1 %v3766_v46 }
 0x3e8   :  { %v3065_v45 = vpop.f32.mrf.mxu1  ;;  %v3105_v32 = vadd.f32 %v3104_v43, %v3063_v47  ;;  %v3765_v47 = vld [vmem:[%s5512_s16 + $0x90] sm:$0xff] }
 0x3e9   :  { %v3106_v48 = vpop.f32.mrf.mxu0  ;;  %v3749_v43 = vld [vmem:[%s5512_s16 + $0x10] sm:$0xff]  ;;  %v3764_v45 = vld [vmem:[%s5512_s16 + $0x88] sm:$0xff] }
 0x3ea   :  { %v3066_v18 = vpop.f32.mrf.mxu1  ;;  %v3748_v48 = vld [vmem:[%s5512_s16 + $0x8] sm:$0xff] }
 0x3eb   :  { %v3107_v31 = vpop.f32.mrf.mxu0  ;;  %v3763_v18 = vld [vmem:[%s5512_s16 + $0x80] sm:$0xff] }
 0x3ec   :  { %v3747_v31 = vld [vmem:[%s5512_s16] sm:$0xff] }
 0x424   :  { %v3143_v12 = vpop.f32.mrf.mxu1 }
 0x425   :  { %v3144_v13 = vadd.f32 %v3143_v12, %v3103_v23  ;;  %v3184_v38 = vpop.f32.mrf.mxu0  ;;  %v3750_v23 = vld [vmem:[%s5512_s16 + $0x18] sm:$0xff]  ;;  %s4951_s16 = smov [#allocation8]  }
 0x426   :  { %v3145_v39 = vpop.f32.mrf.mxu1  ;;  %4321 = vmatpush3.msra.mxu1 %v3750_v23  ;;  %s3881_s10 = sshll.u32 %s4951_s16, 4  ;;  %s3882_s10 = int_to_ptr.vmem [resolvable:$true] %s3881_s10 }
 0x427   :  { %v3185_v17 = vadd.f32 %v3184_v38, %v3144_v13  ;;  %v3146_v27 = vadd.f32 %v3145_v39, %v3105_v32  ;;  %v3186_v62 = vpop.f32.mrf.mxu0  ;;  %4322 = vmatprep.subr.mxu1 %v3765_v47  ;;  %v4950_v13 = vmov 0.0   ;;  %s4911_s28 = scalar_lea.vmem %s3882_s10, 32  ;;  %p4916_p2 = scmp.lt.s32.totalorder %s3882_s10, %s3882_s10 }
 0x428   :  { %v3147_v54 = vpop.f32.mrf.mxu1  ;;  %4323 = vmatpush3.msra.mxu1 %v3749_v43  ;;  %v3871_v38 = vsel %vm3870_vm2, 1.0, %v4950_v13  ;;  %p4912_p1 = scmp.ne.s32.totalorder %s3882_s10, %s4911_s28  ;;  %p4917_p3 = scmp.lt.s32.totalorder %s4911_s28, %s4911_s28 }
 0x429   :  { %v3215_v21 = vmul.f32 %v3204_v15, %v3185_v17  ;;  %v3187_v25 = vadd.f32 %v3186_v62, %v3146_v27  ;;  %v3188_v26 = vpop.f32.mrf.mxu0  ;;  %4324 = vmatprep.subr.mxu1 %v3764_v45 }
 0x42a   :  { %v3148_v28 = vpop.f32.mrf.mxu1  ;;  %4325 = vmatpush3.msra.mxu1 %v3748_v48  ;;  %p4918_p4 = por %p4917_p3, %p4916_p2 }
 0x42b   :  { %v3241_v29 = vadd.f32 %v3230_v53, %v3215_v21  ;;  %v3216_v30 = vmul.f32 %v3208_v35, %v3187_v25  ;;  %v3189_v37 = vpop.f32.mrf.mxu0  ;;  %4326 = vmatprep.subr.mxu1 %v3763_v18 }
 0x42c   :  { %4327 = vmatpush3.msra.mxu1 %v3747_v31  ;;  %p4919_p5 = pnand %p4918_p4, %p4912_p1 }
 0x42d   :  { %v3242_v57 = vadd.f32 %v3234_v19, %v3216_v30  ;;  %v3245_v33 = vmax.f32 %v3241_v29, 0.0 }
 0x42f   :  { %v3246_v34 = vmax.f32 %v3242_v57, 0.0  ;;  %v3249_v3 = vpack.c.bf16 %v3245_v33, %v3245_v33 }
 0x431   :  { %v3250_v44 = vpack.c.bf16 %v3246_v34, %v3246_v34 }
 0x433   :  { %3708 = vmatprep.mubr.bf16.mxu0 %v3250_v44 }
 0x434   :  { %3709 = vmatmul.mubr.bf16.vlgmr.msra.gmra.mxu0 %v3249_v3 }
 0x474   :  { %v3669_v4 = vpop.f32.mrf.mxu1 }
 0x476   :  { %v3671_v40 = vpop.f32.mrf.mxu1 }
 0x478   :  { %v3673_v14 = vpop.f32.mrf.mxu1 }
 0x47a   :  { %v3674_v61 = vpop.f32.mrf.mxu1 }
 0x4f4   :  { %v3710_v50 = vpop.f32.mrf.mxu0 }
 0x4f5   :  { %v3711_v20 = vadd.f32 %v3710_v50, %v3669_v4 }
 0x4f6   :  { %v3712_v58 = vpop.f32.mrf.mxu0 }
 0x4f7   :  { %v3729_v59 = vmul.f32 %v3722_v24, %v3711_v20  ;;  %v3713_v55 = vadd.f32 %v3712_v58, %v3671_v40 }
 0x4f8   :  { %v3714_v2 = vpop.f32.mrf.mxu0 }
 0x4f9   :  { %v3730_v5 = vmul.f32 %v3726_v56, %v3713_v55  ;;  %v3743_v7 = vadd.f32 %v3736_v49, %v3729_v59 }
 0x4fa   :  { %v3715_v8 = vpop.f32.mrf.mxu0 }
 0x4fb   :  { %v3744_v6 = vadd.f32 %v3740_v60, %v3730_v5  ;;  %v3745_v10 = vmax.f32 %v3743_v7, 0.0 }
 0x4fd   :  { %v3746_v9 = vmax.f32 %v3744_v6, 0.0 }
 0x4ff   :  { %3850 = vmatprep.mubr.f32.mxu1 %v3746_v9 }
 0x500   :  { %3851 = vmatmul.mubr.f32.vlgmr.msra.gmra.mxu1 %v3745_v10 }
 0x5c0   :  { %v4328_v12 = vpop.f32.mrf.mxu1 }
 0x5c2   :  { %v4329_v32 = vpop.f32.mrf.mxu1 }
 0x5c3   :  { %v4330_v1 = vadd.f32 %v4329_v32, %v4328_v12 }
 0x5c5   :  { %v3853_v15 = vadd.f32 %v4330_v1, %v4289_v51 }
 0x5c7   :  { %v3872_v39 = vadd.f32 %v3871_v38, %v3853_v15 }
 0x5c9   :  { %3874 = vst.msk [vmem:[#allocation8] sm:$0x3] %vm3873_vm3, %v3872_v39 }
 0x5ca   :  { %4922 = shalt.err (!%p4919_p5)
}
 0x5cb   :  { %3884 = dma.vmem_to_hbm [thread:$0]  %s3882_s10, 32, %s5514_s18, [#allocation4]  }
 0x5cc   :  { %4935 = dma.done.wait [#allocation4], 32  }
 0x5cd   :  { %4936 = vsyncadd [#allocation4], 4294967264 }
 0x5ce   :  { %3888 = vsyncpa [#allocation3], 1 }
 0x5cf   :  { %3889 = vsyncpa [#allocation6], 1 }
 0x5d0   :  { %3890 = vsyncpa [#allocation4], 1 }

</bundles_post_ra>
